<compile_context>
chip_gen: v5e
topology: v5e:2x2
jax: 0.10.0
libtpu: 0.0.40
codegen_flags: <defaults>
</compile_context>

<pallas_src>
import functools

import jax
import jax.numpy as jnp
import numpy as np
from jax.experimental import pallas as pl
from jax.experimental.pallas import tpu as pltpu  # noqa: F401  (TPU backend)

HIDDEN = 32           # hidden_size
REPR = 64             # representation_size
HEADS = 8             # num_heads
SUB = REPR // HEADS   # sub_repr_size
N = 8                 # number of instances (power of two -> // and % are bit ops)
NP = N * N            # number of ordered pairs
EPS = 1e-5            # LayerNorm eps (PyTorch default)

# ------------------------- packed-slab row offsets --------------------------
# weight slab rows (all offsets are multiples of 8; every slice starts at lane 0)
_WUV = 0                      # [32,128]  [Wu^T | Wu2^T]   -> k||v projection
_WF1 = _WUV + HIDDEN          # [32,128]  Wf1^T            -> FFN first linear
_WP = _WF1 + HIDDEN           # [64, 64]  Wp^T             -> pairwise projection
_WM = _WP + REPR              # [64, 64]  block-diag per-head message weight
_WKAV = _WM + REPR            # [128,96]  kv -> [ V | ka(attn1|attn2) | kb(attn1|attn2) ]
_WF2 = _WKAV + 2 * REPR       # [128,32]  Wf2^T            -> FFN second linear
_WQ = _WF2 + 4 * HIDDEN       # [64, 16]  q -> fused attn1|attn2 logit features
_WA = _WQ + REPR              # [64, 32]  Wa^T             -> aggregate linear
_WROWS = _WA + REPR           # 576 rows total

# bias slab rows
(_B_UV, _B_F1, _B_P, _B_M, _B_12, _B_A,
 _B_G1, _B_BE1, _B_G2, _B_BE2, _B_F2) = range(11)
_BROWS = 16


def _layer_norm(x, g, b):
    mu = jnp.mean(x, axis=-1, keepdims=True)
    var = jnp.mean((x - mu) ** 2, axis=-1, keepdims=True)
    return (x - mu) * jax.lax.rsqrt(var + EPS) * g + b


# ----------------------------- Pallas kernel --------------------------------

def hof_kernel(app_ref, spat_ref, w_ref, b_ref, out_ref):
    dot = functools.partial(jnp.dot, preferred_element_type=jnp.float32)
    relu = lambda t: jnp.maximum(t, 0.0)
    f32 = jnp.float32

    app = app_ref[...]                       # [N, HIDDEN]
    spat = spat_ref[...]                     # [NP, R]   pair-major, p = a*N + b

    # ---- selection / broadcast constants, generated on the VPU (no DMAs) ----
    # N and SUB are powers of two, so // and % reduce to bit ops.
    p_row = jax.lax.broadcasted_iota(jnp.int32, (NP, N), 0)
    c_col = jax.lax.broadcasted_iota(jnp.int32, (NP, N), 1)
    sela = (jnp.bitwise_and(p_row, ~(N - 1)) == c_col * N).astype(f32)   # c == p // N
    selb = (jnp.bitwise_and(p_row, N - 1) == c_col).astype(f32)          # c == p %  N
    c_row = jax.lax.broadcasted_iota(jnp.int32, (N, NP), 0)
    p_col = jax.lax.broadcasted_iota(jnp.int32, (N, NP), 1)
    selbt = (jnp.bitwise_and(p_col, N - 1) == c_row).astype(f32)         # [N, NP]
    h_row = jax.lax.broadcasted_iota(jnp.int32, (HEADS, REPR), 0)
    r_col = jax.lax.broadcasted_iota(jnp.int32, (HEADS, REPR), 1)
    expand = (jnp.bitwise_and(r_col, ~(SUB - 1)) == h_row * SUB).astype(f32)  # [H, R]

    # ---- projections (fused, lane-dense where possible) ---------------------
    # k||v from ONE [N,32]x[32,128] matmul -> full unmasked 128-lane rows.
    kv = relu(dot(app, w_ref[_WUV:_WUV + HIDDEN, :])
              + b_ref[_B_UV:_B_UV + 1, :])                               # [N, 2R]
    q = relu(dot(spat, w_ref[_WP:_WP + REPR, 0:REPR])
             + b_ref[_B_P:_B_P + 1, 0:REPR])                             # [NP, R]

    # kv -> [ V (64) | a-side attn-k (attn1|attn2, 16) | b-side attn-k (16) ]
    kav = dot(kv, w_ref[_WKAV:_WKAV + 2 * REPR, 0:REPR + 4 * HEADS])     # [N, 96]
    a_exp = dot(sela, kav[:, 0:REPR + 2 * HEADS])        # rows gathered by a = p // N
    b_exp = dot(selb, kav[:, REPR + 2 * HEADS:REPR + 4 * HEADS])  # rows by b = p % N
    qa = dot(q, w_ref[_WQ:_WQ + REPR, 0:2 * HEADS])                      # [NP, 16]

    # fused attn1|attn2 logits -> one sigmoid pass -> average
    logits = (a_exp[:, REPR:REPR + 2 * HEADS] + b_exp + qa
              + b_ref[_B_12:_B_12 + 1, 0:2 * HEADS])                     # [NP, 2H]
    sig = jax.nn.sigmoid(logits)
    w_attn = (sig[:, 0:HEADS] + sig[:, HEADS:2 * HEADS]) * 0.5           # [NP, H]

    # messages: (V[a] * Qspat[a,b]) through the block-diag per-head linear
    v_rep = a_exp[:, 0:REPR]                                             # [NP, R]
    msg = (dot(v_rep * q, w_ref[_WM:_WM + REPR, 0:REPR])
           + b_ref[_B_M:_B_M + 1, 0:REPR])                               # [NP, R]

    # weighted sum over the first pair index a  (torch: sum(w*m, dim=0))
    w_full = dot(w_attn, expand)                                         # [NP, R]
    agg = relu(dot(selbt, w_full * msg))                                 # [N, R]
    agg = (dot(agg, w_ref[_WA:_WA + REPR, 0:HIDDEN])
           + b_ref[_B_A:_B_A + 1, 0:HIDDEN])                             # [N, HIDDEN]
    x = _layer_norm(app + agg,
                    b_ref[_B_G1:_B_G1 + 1, 0:HIDDEN],
                    b_ref[_B_BE1:_B_BE1 + 1, 0:HIDDEN])

    # FFN: LN(x + W2(relu(W1 x)))   (dropout = identity)
    h = relu(dot(x, w_ref[_WF1:_WF1 + HIDDEN, :])
             + b_ref[_B_F1:_B_F1 + 1, :])                                # [N, 4*HIDDEN]
    y = x + dot(h, w_ref[_WF2:_WF2 + 4 * HIDDEN, 0:HIDDEN]) \
          + b_ref[_B_F2:_B_F2 + 1, 0:HIDDEN]
    out_ref[...] = _layer_norm(y,
                               b_ref[_B_G2:_B_G2 + 1, 0:HIDDEN],
                               b_ref[_B_BE2:_B_BE2 + 1, 0:HIDDEN])


# ----------------------- one-time host-side packing --------------------------

def pack_params(P):
    """Pack all weights/biases into two lane-dense slabs (call once, reuse)."""
    def to_np(x):
        return np.asarray(x, dtype=np.float32)

    def head_cols_to_full(w_part):         # [H, S] per-head cols -> dense [R, H]
        m = np.zeros((HEADS, SUB, HEADS), np.float32)
        for h in range(HEADS):
            m[h, :, h] = w_part[h]
        return m.reshape(REPR, HEADS)

    def block_diag_message(wm):            # [H, S_out, S_in] -> block-diag [R_in, R_out]
        blk = np.zeros((HEADS, SUB, HEADS, SUB), np.float32)
        for h in range(HEADS):
            blk[h, :, h, :] = wm[h].T      # [S_in, S_out]
        return blk.reshape(REPR, REPR)

    W1, W2 = to_np(P['W1']), to_np(P['W2'])
    wka = np.concatenate([head_cols_to_full(W1[:, :SUB]),
                          head_cols_to_full(W2[:, :SUB])], axis=1)            # [R, 2H]
    wkb = np.concatenate([head_cols_to_full(W1[:, SUB:2 * SUB]),
                          head_cols_to_full(W2[:, SUB:2 * SUB])], axis=1)     # [R, 2H]
    wq = np.concatenate([head_cols_to_full(W1[:, 2 * SUB:]),
                         head_cols_to_full(W2[:, 2 * SUB:])], axis=1)         # [R, 2H]

    # kv [N, 2R] -> [ V (R) | a-side attn-k (2H) | b-side attn-k (2H) ]
    w_kav = np.zeros((2 * REPR, REPR + 4 * HEADS), np.float32)
    w_kav[REPR:, 0:REPR] = np.eye(REPR, dtype=np.float32)       # V passes through
    w_kav[:REPR, REPR:REPR + 2 * HEADS] = wka
    w_kav[:REPR, REPR + 2 * HEADS:] = wkb

    w = np.zeros((_WROWS, 128), np.float32)
    w[_WUV:_WUV + HIDDEN, :] = np.concatenate(
        [to_np(P['Wu']).T, to_np(P['Wu2']).T], axis=1)
    w[_WF1:_WF1 + HIDDEN, :] = to_np(P['Wf1']).T
    w[_WP:_WP + REPR, 0:REPR] = to_np(P['Wp']).T
    w[_WM:_WM + REPR, 0:REPR] = block_diag_message(to_np(P['Wm']))
    w[_WKAV:_WKAV + 2 * REPR, 0:REPR + 4 * HEADS] = w_kav
    w[_WF2:_WF2 + 4 * HIDDEN, 0:HIDDEN] = to_np(P['Wf2']).T
    w[_WQ:_WQ + REPR, 0:2 * HEADS] = wq
    w[_WA:_WA + REPR, 0:HIDDEN] = to_np(P['Wa']).T

    b = np.zeros((_BROWS, 128), np.float32)
    b[_B_UV, :] = np.concatenate([to_np(P['bu']), to_np(P['bu2'])])
    b[_B_F1, :] = to_np(P['bf1'])
    b[_B_P, 0:REPR] = to_np(P['bp'])
    b[_B_M, 0:REPR] = to_np(P['bm']).reshape(REPR)
    b[_B_12, 0:2 * HEADS] = np.concatenate([to_np(P['b1']), to_np(P['b2'])])
    b[_B_A, 0:HIDDEN] = to_np(P['ba'])
    b[_B_G1, 0:HIDDEN] = to_np(P['g1'])
    b[_B_BE1, 0:HIDDEN] = to_np(P['be1'])
    b[_B_G2, 0:HIDDEN] = to_np(P['g2'])
    b[_B_BE2, 0:HIDDEN] = to_np(P['be2'])
    b[_B_F2, 0:HIDDEN] = to_np(P['bf2'])
    return jnp.asarray(w), jnp.asarray(b)


# ------------------------------ glue / wrapper -------------------------------

def _full_spec(shape):
    nd = len(shape)
    return pl.BlockSpec(shape, lambda i, _nd=nd: (0,) * _nd)


@jax.jit
def hof_forward_pallas(appearance, spatial, w_slab, b_slab):
    n = appearance.shape[0]
    spat_flat = spatial.reshape(n * n, REPR).astype(jnp.float32)
    inputs = (appearance.astype(jnp.float32), spat_flat, w_slab, b_slab)
    return pl.pallas_call(
        hof_kernel,
        out_shape=jax.ShapeDtypeStruct((n, HIDDEN), jnp.float32),
        grid=(1,),
        in_specs=[_full_spec(x.shape) for x in inputs],
        out_specs=_full_spec((n, HIDDEN)),
    )(*inputs)


# ----------------------------- params / reference ----------------------------

def init_params(key):
    ks = jax.random.split(key, 9)

    def lin(k, fan_in, w_shape, b_shape):
        bound = 1.0 / np.sqrt(fan_in)
        kw, kb = jax.random.split(k)
        w = jax.random.uniform(kw, w_shape, jnp.float32, -bound, bound)
        b = jax.random.uniform(kb, b_shape, jnp.float32, -bound, bound)
        return w, b

    P = {}
    P['Wu'], P['bu'] = lin(ks[0], HIDDEN, (REPR, HIDDEN), (REPR,))
    P['Wu2'], P['bu2'] = lin(ks[1], HIDDEN, (REPR, HIDDEN), (REPR,))
    P['Wp'], P['bp'] = lin(ks[2], REPR, (REPR, REPR), (REPR,))
    P['W1'], P['b1'] = lin(ks[3], 3 * SUB, (HEADS, 3 * SUB), (HEADS,))
    P['W2'], P['b2'] = lin(ks[4], 3 * SUB, (HEADS, 3 * SUB), (HEADS,))
    P['Wm'], P['bm'] = lin(ks[5], SUB, (HEADS, SUB, SUB), (HEADS, SUB))
    P['Wa'], P['ba'] = lin(ks[6], REPR, (HIDDEN, REPR), (HIDDEN,))
    P['g1'] = jnp.ones((HIDDEN,), jnp.float32)
    P['be1'] = jnp.zeros((HIDDEN,), jnp.float32)
    P['Wf1'], P['bf1'] = lin(ks[7], HIDDEN, (4 * HIDDEN, HIDDEN), (4 * HIDDEN,))
    P['Wf2'], P['bf2'] = lin(ks[8], 4 * HIDDEN, (HIDDEN, 4 * HIDDEN), (HIDDEN,))
    P['g2'] = jnp.ones((HIDDEN,), jnp.float32)
    P['be2'] = jnp.zeros((HIDDEN,), jnp.float32)
    return P


def reference_forward(appearance, spatial, P):
    """Pure-JAX mirror of the PyTorch forward (for validation)."""
    n = appearance.shape[0]
    relu = lambda t: jnp.maximum(t, 0.0)
    Qs = relu(spatial @ P['Wp'].T + P['bp']).reshape(n, n, HEADS, SUB).transpose(2, 0, 1, 3)
    Ka = relu(appearance @ P['Wu'].T + P['bu']).reshape(n, HEADS, SUB).transpose(1, 0, 2)
    Va = relu(appearance @ P['Wu2'].T + P['bu2']).reshape(n, HEADS, SUB).transpose(1, 0, 2)
    Ki = jnp.broadcast_to(Ka[:, :, None, :], (HEADS, n, n, SUB))
    Kj = jnp.broadcast_to(Ka[:, None, :, :], (HEADS, n, n, SUB))
    feat = jnp.concatenate([Ki, Kj, Qs], axis=-1)                     # [H,n,n,3S]
    l1 = jnp.einsum('hnmk,hk->hnm', feat, P['W1']) + P['b1'][:, None, None]
    l2 = jnp.einsum('hnmk,hk->hnm', feat, P['W2']) + P['b2'][:, None, None]
    w = (jax.nn.sigmoid(l1) + jax.nn.sigmoid(l2)) / 2
    mess = Va[:, :, None, :] * Qs
    msg = jnp.einsum('hnms,hts->hnmt', mess, P['Wm']) + P['bm'][:, None, None, :]
    attn = jnp.sum(w[..., None] * msg, axis=1)                        # [H,n,S]
    agg = attn.transpose(1, 0, 2).reshape(n, REPR)
    agg = relu(agg) @ P['Wa'].T + P['ba']
    x = _layer_norm(appearance + agg, P['g1'], P['be1'])
    h = relu(x @ P['Wf1'].T + P['bf1'])
    y = x + h @ P['Wf2'].T + P['bf2']
    return _layer_norm(y, P['g2'], P['be2'])


if __name__ == "__main__":
    key = jax.random.PRNGKey(0)
    k1, k2, k3 = jax.random.split(key, 3)
    appearance = jax.random.normal(k1, (N, HIDDEN), jnp.float32)
    spatial = jax.random.normal(k2, (N, N, REPR), jnp.float32)
    P = init_params(k3)

    # hoisted one-time weight packing (reused across every forward call)
    w_slab, b_slab = pack_params(P)

    out = hof_forward_pallas(appearance, spatial, w_slab, b_slab)
    out = jax.block_until_ready(out)

    ref = reference_forward(appearance, spatial, P)
    assert out.shape == (N, HIDDEN)
    np.testing.assert_allclose(np.asarray(out), np.asarray(ref), rtol=2e-3, atol=2e-3)
    print("KERNEL_OK")
</pallas_src>

<mosaic_0001>
module attributes {stable_mosaic.version = 11 : i64} {
  func.func @hof_kernel(%arg0: i32, %arg1: memref<8x32xf32, #tpu.memory_space<vmem>>, %arg2: memref<64x64xf32, #tpu.memory_space<vmem>>, %arg3: memref<576x128xf32, #tpu.memory_space<vmem>>, %arg4: memref<16x128xf32, #tpu.memory_space<vmem>>, %arg5: memref<8x32xf32, #tpu.memory_space<vmem>>) attributes {dimension_semantics = [#tpu.dimension_semantics<arbitrary>], iteration_bounds = array<i64: 1>, scalar_prefetch = 0 : i64, scratch_operands = 0 : i64, tpu.core_type = #tpu.core_type<tc>, window_params = [{pipeline_mode = #tpu.pipeline_mode<synchronous>, transform_indices = @transform_0, window_bounds = array<i64: 8, 32>}, {pipeline_mode = #tpu.pipeline_mode<synchronous>, transform_indices = @transform_1, window_bounds = array<i64: 64, 64>}, {pipeline_mode = #tpu.pipeline_mode<synchronous>, transform_indices = @transform_2, window_bounds = array<i64: 576, 128>}, {pipeline_mode = #tpu.pipeline_mode<synchronous>, transform_indices = @transform_3, window_bounds = array<i64: 16, 128>}, {pipeline_mode = #tpu.pipeline_mode<synchronous>, transform_indices = @transform_4, window_bounds = array<i64: 8, 32>}]} {
    %c0 = arith.constant 0 : index
    %c0_0 = arith.constant 0 : index
    %0 = vector.load %arg1[%c0, %c0_0] : memref<8x32xf32, #tpu.memory_space<vmem>>, vector<8x32xf32>
    %c0_1 = arith.constant 0 : index
    %c0_2 = arith.constant 0 : index
    %1 = vector.load %arg2[%c0_1, %c0_2] : memref<64x64xf32, #tpu.memory_space<vmem>>, vector<64x64xf32>
    %2 = tpu.iota {dimensions = array<i32: 0>} : vector<64x8xi32>
    %3 = tpu.iota {dimensions = array<i32: 1>} : vector<64x8xi32>
    %c-8_i32 = arith.constant -8 : i32
    %4 = vector.broadcast %c-8_i32 : i32 to vector<64x8xi32>
    %5 = arith.andi %2, %4 : vector<64x8xi32>
    %c8_i32 = arith.constant 8 : i32
    %6 = vector.broadcast %c8_i32 : i32 to vector<64x8xi32>
    %7 = arith.muli %3, %6 : vector<64x8xi32>
    %8 = arith.cmpi eq, %5, %7 : vector<64x8xi32>
    %9 = arith.extui %8 : vector<64x8xi1> to vector<64x8xi32>
    %10 = arith.sitofp %9 : vector<64x8xi32> to vector<64x8xf32>
    %c7_i32 = arith.constant 7 : i32
    %11 = vector.broadcast %c7_i32 : i32 to vector<64x8xi32>
    %12 = arith.andi %2, %11 : vector<64x8xi32>
    %13 = arith.cmpi eq, %12, %3 : vector<64x8xi32>
    %14 = arith.extui %13 : vector<64x8xi1> to vector<64x8xi32>
    %15 = arith.sitofp %14 : vector<64x8xi32> to vector<64x8xf32>
    %16 = tpu.iota {dimensions = array<i32: 0>} : vector<8x64xi32>
    %17 = tpu.iota {dimensions = array<i32: 1>} : vector<8x64xi32>
    %c7_i32_3 = arith.constant 7 : i32
    %18 = vector.broadcast %c7_i32_3 : i32 to vector<8x64xi32>
    %19 = arith.andi %17, %18 : vector<8x64xi32>
    %20 = arith.cmpi eq, %19, %16 : vector<8x64xi32>
    %21 = arith.extui %20 : vector<8x64xi1> to vector<8x64xi32>
    %22 = arith.sitofp %21 : vector<8x64xi32> to vector<8x64xf32>
    %23 = tpu.iota {dimensions = array<i32: 0>} : vector<8x64xi32>
    %24 = tpu.iota {dimensions = array<i32: 1>} : vector<8x64xi32>
    %c-8_i32_4 = arith.constant -8 : i32
    %25 = vector.broadcast %c-8_i32_4 : i32 to vector<8x64xi32>
    %26 = arith.andi %24, %25 : vector<8x64xi32>
    %c8_i32_5 = arith.constant 8 : i32
    %27 = vector.broadcast %c8_i32_5 : i32 to vector<8x64xi32>
    %28 = arith.muli %23, %27 : vector<8x64xi32>
    %29 = arith.cmpi eq, %26, %28 : vector<8x64xi32>
    %30 = arith.extui %29 : vector<8x64xi1> to vector<8x64xi32>
    %31 = arith.sitofp %30 : vector<8x64xi32> to vector<8x64xf32>
    %c0_6 = arith.constant 0 : index
    %c0_7 = arith.constant 0 : index
    %32 = vector.load %arg3[%c0_6, %c0_7] : memref<576x128xf32, #tpu.memory_space<vmem>>, vector<32x128xf32>
    %cst = arith.constant dense<0.000000e+00> : vector<8x128xf32>
    %33 = tpu.matmul %0, %32, %cst {dimension_numbers = #tpu.dot_dimension_numbers<[1], [0], [0], [1], [0, 0, 1, 1], [], []>} : vector<8x32xf32>, vector<32x128xf32>, vector<8x128xf32> -> vector<8x128xf32>
    %c0_8 = arith.constant 0 : index
    %c0_9 = arith.constant 0 : index
    %34 = vector.load %arg4[%c0_8, %c0_9] : memref<16x128xf32, #tpu.memory_space<vmem>>, vector<1x128xf32>
    %35 = vector.broadcast %34 : vector<1x128xf32> to vector<8x128xf32>
    %36 = arith.addf %33, %35 : vector<8x128xf32>
    %cst_10 = arith.constant 0.000000e+00 : f32
    %37 = vector.broadcast %cst_10 : f32 to vector<8x128xf32>
    %38 = arith.maximumf %36, %37 : vector<8x128xf32>
    %c64 = arith.constant 64 : index
    %c0_11 = arith.constant 0 : index
    %39 = vector.load %arg3[%c64, %c0_11] : memref<576x128xf32, #tpu.memory_space<vmem>>, vector<64x64xf32>
    %cst_12 = arith.constant dense<0.000000e+00> : vector<64x64xf32>
    %40 = tpu.matmul %1, %39, %cst_12 {dimension_numbers = #tpu.dot_dimension_numbers<[1], [0], [0], [1], [0, 0, 1, 1], [], []>} : vector<64x64xf32>, vector<64x64xf32>, vector<64x64xf32> -> vector<64x64xf32>
    %c2 = arith.constant 2 : index
    %c0_13 = arith.constant 0 : index
    %41 = vector.load %arg4[%c2, %c0_13] : memref<16x128xf32, #tpu.memory_space<vmem>>, vector<1x64xf32>
    %42 = vector.broadcast %41 : vector<1x64xf32> to vector<64x64xf32>
    %43 = arith.addf %40, %42 : vector<64x64xf32>
    %cst_14 = arith.constant 0.000000e+00 : f32
    %44 = vector.broadcast %cst_14 : f32 to vector<64x64xf32>
    %45 = arith.maximumf %43, %44 : vector<64x64xf32>
    %c192 = arith.constant 192 : index
    %c0_15 = arith.constant 0 : index
    %46 = vector.load %arg3[%c192, %c0_15] : memref<576x128xf32, #tpu.memory_space<vmem>>, vector<128x96xf32>
    %cst_16 = arith.constant dense<0.000000e+00> : vector<8x96xf32>
    %47 = tpu.matmul %38, %46, %cst_16 {dimension_numbers = #tpu.dot_dimension_numbers<[1], [0], [0], [1], [0, 0, 1, 1], [], []>} : vector<8x128xf32>, vector<128x96xf32>, vector<8x96xf32> -> vector<8x96xf32>
    %48 = vector.extract_strided_slice %47 {offsets = [0, 0], sizes = [8, 80], strides = [1, 1]} : vector<8x96xf32> to vector<8x80xf32>
    %cst_17 = arith.constant dense<0.000000e+00> : vector<64x80xf32>
    %49 = tpu.matmul %10, %48, %cst_17 {dimension_numbers = #tpu.dot_dimension_numbers<[1], [0], [0], [1], [0, 0, 1, 1], [], []>} : vector<64x8xf32>, vector<8x80xf32>, vector<64x80xf32> -> vector<64x80xf32>
    %50 = vector.extract_strided_slice %47 {offsets = [0, 80], sizes = [8, 16], strides = [1, 1]} : vector<8x96xf32> to vector<8x16xf32>
    %cst_18 = arith.constant dense<0.000000e+00> : vector<64x16xf32>
    %51 = tpu.matmul %15, %50, %cst_18 {dimension_numbers = #tpu.dot_dimension_numbers<[1], [0], [0], [1], [0, 0, 1, 1], [], []>} : vector<64x8xf32>, vector<8x16xf32>, vector<64x16xf32> -> vector<64x16xf32>
    %c448 = arith.constant 448 : index
    %c0_19 = arith.constant 0 : index
    %52 = vector.load %arg3[%c448, %c0_19] : memref<576x128xf32, #tpu.memory_space<vmem>>, vector<64x16xf32>
    %cst_20 = arith.constant dense<0.000000e+00> : vector<64x16xf32>
    %53 = tpu.matmul %45, %52, %cst_20 {dimension_numbers = #tpu.dot_dimension_numbers<[1], [0], [0], [1], [0, 0, 1, 1], [], []>} : vector<64x64xf32>, vector<64x16xf32>, vector<64x16xf32> -> vector<64x16xf32>
    %54 = vector.extract_strided_slice %49 {offsets = [0, 64], sizes = [64, 16], strides = [1, 1]} : vector<64x80xf32> to vector<64x16xf32>
    %55 = arith.addf %54, %51 : vector<64x16xf32>
    %56 = arith.addf %55, %53 : vector<64x16xf32>
    %c4 = arith.constant 4 : index
    %c0_21 = arith.constant 0 : index
    %57 = vector.load %arg4[%c4, %c0_21] : memref<16x128xf32, #tpu.memory_space<vmem>>, vector<1x16xf32>
    %58 = vector.broadcast %57 : vector<1x16xf32> to vector<64x16xf32>
    %59 = arith.addf %56, %58 : vector<64x16xf32>
    %60 = arith.negf %59 : vector<64x16xf32>
    %61 = math.exp %60 : vector<64x16xf32>
    %cst_22 = arith.constant 1.000000e+00 : f32
    %62 = vector.broadcast %cst_22 : f32 to vector<64x16xf32>
    %63 = arith.addf %62, %61 : vector<64x16xf32>
    %64 = arith.divf %62, %63 : vector<64x16xf32>
    %65 = vector.extract_strided_slice %64 {offsets = [0, 0], sizes = [64, 8], strides = [1, 1]} : vector<64x16xf32> to vector<64x8xf32>
    %66 = vector.extract_strided_slice %64 {offsets = [0, 8], sizes = [64, 8], strides = [1, 1]} : vector<64x16xf32> to vector<64x8xf32>
    %67 = arith.addf %65, %66 : vector<64x8xf32>
    %cst_23 = arith.constant 5.000000e-01 : f32
    %68 = vector.broadcast %cst_23 : f32 to vector<64x8xf32>
    %69 = arith.mulf %67, %68 : vector<64x8xf32>
    %70 = vector.extract_strided_slice %49 {offsets = [0, 0], sizes = [64, 64], strides = [1, 1]} : vector<64x80xf32> to vector<64x64xf32>
    %71 = arith.mulf %70, %45 : vector<64x64xf32>
    %c128 = arith.constant 128 : index
    %c0_24 = arith.constant 0 : index
    %72 = vector.load %arg3[%c128, %c0_24] : memref<576x128xf32, #tpu.memory_space<vmem>>, vector<64x64xf32>
    %cst_25 = arith.constant dense<0.000000e+00> : vector<64x64xf32>
    %73 = tpu.matmul %71, %72, %cst_25 {dimension_numbers = #tpu.dot_dimension_numbers<[1], [0], [0], [1], [0, 0, 1, 1], [], []>} : vector<64x64xf32>, vector<64x64xf32>, vector<64x64xf32> -> vector<64x64xf32>
    %c3 = arith.constant 3 : index
    %c0_26 = arith.constant 0 : index
    %74 = vector.load %arg4[%c3, %c0_26] : memref<16x128xf32, #tpu.memory_space<vmem>>, vector<1x64xf32>
    %75 = vector.broadcast %74 : vector<1x64xf32> to vector<64x64xf32>
    %76 = arith.addf %73, %75 : vector<64x64xf32>
    %cst_27 = arith.constant dense<0.000000e+00> : vector<64x64xf32>
    %77 = tpu.matmul %69, %31, %cst_27 {dimension_numbers = #tpu.dot_dimension_numbers<[1], [0], [0], [1], [0, 0, 1, 1], [], []>} : vector<64x8xf32>, vector<8x64xf32>, vector<64x64xf32> -> vector<64x64xf32>
    %78 = arith.mulf %77, %76 : vector<64x64xf32>
    %cst_28 = arith.constant dense<0.000000e+00> : vector<8x64xf32>
    %79 = tpu.matmul %22, %78, %cst_28 {dimension_numbers = #tpu.dot_dimension_numbers<[1], [0], [0], [1], [0, 0, 1, 1], [], []>} : vector<8x64xf32>, vector<64x64xf32>, vector<8x64xf32> -> vector<8x64xf32>
    %cst_29 = arith.constant 0.000000e+00 : f32
    %80 = vector.broadcast %cst_29 : f32 to vector<8x64xf32>
    %81 = arith.maximumf %79, %80 : vector<8x64xf32>
    %c512 = arith.constant 512 : index
    %c0_30 = arith.constant 0 : index
    %82 = vector.load %arg3[%c512, %c0_30] : memref<576x128xf32, #tpu.memory_space<vmem>>, vector<64x32xf32>
    %cst_31 = arith.constant dense<0.000000e+00> : vector<8x32xf32>
    %83 = tpu.matmul %81, %82, %cst_31 {dimension_numbers = #tpu.dot_dimension_numbers<[1], [0], [0], [1], [0, 0, 1, 1], [], []>} : vector<8x64xf32>, vector<64x32xf32>, vector<8x32xf32> -> vector<8x32xf32>
    %c5 = arith.constant 5 : index
    %c0_32 = arith.constant 0 : index
    %84 = vector.load %arg4[%c5, %c0_32] : memref<16x128xf32, #tpu.memory_space<vmem>>, vector<1x32xf32>
    %85 = vector.broadcast %84 : vector<1x32xf32> to vector<8x32xf32>
    %86 = arith.addf %83, %85 : vector<8x32xf32>
    %87 = arith.addf %0, %86 : vector<8x32xf32>
    %c6 = arith.constant 6 : index
    %c0_33 = arith.constant 0 : index
    %88 = vector.load %arg4[%c6, %c0_33] : memref<16x128xf32, #tpu.memory_space<vmem>>, vector<1x32xf32>
    %c7 = arith.constant 7 : index
    %c0_34 = arith.constant 0 : index
    %89 = vector.load %arg4[%c7, %c0_34] : memref<16x128xf32, #tpu.memory_space<vmem>>, vector<1x32xf32>
    %cst_35 = arith.constant dense<0.000000e+00> : vector<8xf32>
    %90 = vector.multi_reduction <add>, %87, %cst_35 [1] : vector<8x32xf32> to vector<8xf32>
    %91 = vector.shape_cast %90 : vector<8xf32> to vector<8x1xf32>
    %cst_36 = arith.constant 3.200000e+01 : f32
    %92 = vector.broadcast %cst_36 : f32 to vector<8x1xf32>
    %93 = arith.divf %91, %92 : vector<8x1xf32>
    %94 = vector.broadcast %93 : vector<8x1xf32> to vector<8x32xf32>
    %95 = arith.subf %87, %94 : vector<8x32xf32>
    %96 = arith.mulf %95, %95 : vector<8x32xf32>
    %cst_37 = arith.constant dense<0.000000e+00> : vector<8xf32>
    %97 = vector.multi_reduction <add>, %96, %cst_37 [1] : vector<8x32xf32> to vector<8xf32>
    %98 = vector.shape_cast %97 : vector<8xf32> to vector<8x1xf32>
    %cst_38 = arith.constant 3.200000e+01 : f32
    %99 = vector.broadcast %cst_38 : f32 to vector<8x1xf32>
    %100 = arith.divf %98, %99 : vector<8x1xf32>
    %101 = vector.broadcast %93 : vector<8x1xf32> to vector<8x32xf32>
    %102 = arith.subf %87, %101 : vector<8x32xf32>
    %cst_39 = arith.constant 9.99999974E-6 : f32
    %103 = vector.broadcast %cst_39 : f32 to vector<8x1xf32>
    %104 = arith.addf %100, %103 : vector<8x1xf32>
    %105 = math.rsqrt %104 : vector<8x1xf32>
    %106 = vector.broadcast %105 : vector<8x1xf32> to vector<8x32xf32>
    %107 = arith.mulf %102, %106 : vector<8x32xf32>
    %108 = vector.broadcast %88 : vector<1x32xf32> to vector<8x32xf32>
    %109 = arith.mulf %107, %108 : vector<8x32xf32>
    %110 = vector.broadcast %89 : vector<1x32xf32> to vector<8x32xf32>
    %111 = arith.addf %109, %110 : vector<8x32xf32>
    %c32 = arith.constant 32 : index
    %c0_40 = arith.constant 0 : index
    %112 = vector.load %arg3[%c32, %c0_40] : memref<576x128xf32, #tpu.memory_space<vmem>>, vector<32x128xf32>
    %cst_41 = arith.constant dense<0.000000e+00> : vector<8x128xf32>
    %113 = tpu.matmul %111, %112, %cst_41 {dimension_numbers = #tpu.dot_dimension_numbers<[1], [0], [0], [1], [0, 0, 1, 1], [], []>} : vector<8x32xf32>, vector<32x128xf32>, vector<8x128xf32> -> vector<8x128xf32>
    %c1 = arith.constant 1 : index
    %c0_42 = arith.constant 0 : index
    %114 = vector.load %arg4[%c1, %c0_42] : memref<16x128xf32, #tpu.memory_space<vmem>>, vector<1x128xf32>
    %115 = vector.broadcast %114 : vector<1x128xf32> to vector<8x128xf32>
    %116 = arith.addf %113, %115 : vector<8x128xf32>
    %cst_43 = arith.constant 0.000000e+00 : f32
    %117 = vector.broadcast %cst_43 : f32 to vector<8x128xf32>
    %118 = arith.maximumf %116, %117 : vector<8x128xf32>
    %c320 = arith.constant 320 : index
    %c0_44 = arith.constant 0 : index
    %119 = vector.load %arg3[%c320, %c0_44] : memref<576x128xf32, #tpu.memory_space<vmem>>, vector<128x32xf32>
    %cst_45 = arith.constant dense<0.000000e+00> : vector<8x32xf32>
    %120 = tpu.matmul %118, %119, %cst_45 {dimension_numbers = #tpu.dot_dimension_numbers<[1], [0], [0], [1], [0, 0, 1, 1], [], []>} : vector<8x128xf32>, vector<128x32xf32>, vector<8x32xf32> -> vector<8x32xf32>
    %121 = arith.addf %111, %120 : vector<8x32xf32>
    %c10 = arith.constant 10 : index
    %c0_46 = arith.constant 0 : index
    %122 = vector.load %arg4[%c10, %c0_46] : memref<16x128xf32, #tpu.memory_space<vmem>>, vector<1x32xf32>
    %123 = vector.broadcast %122 : vector<1x32xf32> to vector<8x32xf32>
    %124 = arith.addf %121, %123 : vector<8x32xf32>
    %c8 = arith.constant 8 : index
    %c0_47 = arith.constant 0 : index
    %125 = vector.load %arg4[%c8, %c0_47] : memref<16x128xf32, #tpu.memory_space<vmem>>, vector<1x32xf32>
    %c9 = arith.constant 9 : index
    %c0_48 = arith.constant 0 : index
    %126 = vector.load %arg4[%c9, %c0_48] : memref<16x128xf32, #tpu.memory_space<vmem>>, vector<1x32xf32>
    %cst_49 = arith.constant dense<0.000000e+00> : vector<8xf32>
    %127 = vector.multi_reduction <add>, %124, %cst_49 [1] : vector<8x32xf32> to vector<8xf32>
    %128 = vector.shape_cast %127 : vector<8xf32> to vector<8x1xf32>
    %cst_50 = arith.constant 3.200000e+01 : f32
    %129 = vector.broadcast %cst_50 : f32 to vector<8x1xf32>
    %130 = arith.divf %128, %129 : vector<8x1xf32>
    %131 = vector.broadcast %130 : vector<8x1xf32> to vector<8x32xf32>
    %132 = arith.subf %124, %131 : vector<8x32xf32>
    %133 = arith.mulf %132, %132 : vector<8x32xf32>
    %cst_51 = arith.constant dense<0.000000e+00> : vector<8xf32>
    %134 = vector.multi_reduction <add>, %133, %cst_51 [1] : vector<8x32xf32> to vector<8xf32>
    %135 = vector.shape_cast %134 : vector<8xf32> to vector<8x1xf32>
    %cst_52 = arith.constant 3.200000e+01 : f32
    %136 = vector.broadcast %cst_52 : f32 to vector<8x1xf32>
    %137 = arith.divf %135, %136 : vector<8x1xf32>
    %138 = vector.broadcast %130 : vector<8x1xf32> to vector<8x32xf32>
    %139 = arith.subf %124, %138 : vector<8x32xf32>
    %cst_53 = arith.constant 9.99999974E-6 : f32
    %140 = vector.broadcast %cst_53 : f32 to vector<8x1xf32>
    %141 = arith.addf %137, %140 : vector<8x1xf32>
    %142 = math.rsqrt %141 : vector<8x1xf32>
    %143 = vector.broadcast %142 : vector<8x1xf32> to vector<8x32xf32>
    %144 = arith.mulf %139, %143 : vector<8x32xf32>
    %145 = vector.broadcast %125 : vector<1x32xf32> to vector<8x32xf32>
    %146 = arith.mulf %144, %145 : vector<8x32xf32>
    %147 = vector.broadcast %126 : vector<1x32xf32> to vector<8x32xf32>
    %148 = arith.addf %146, %147 : vector<8x32xf32>
    %c0_54 = arith.constant 0 : index
    %c0_55 = arith.constant 0 : index
    %149 = vector.load %arg5[%c0_54, %c0_55] : memref<8x32xf32, #tpu.memory_space<vmem>>, vector<8x32xf32>
    tpu.vector_store %arg5[%c0_54, %c0_55], %148 {strides = array<i32>} : memref<8x32xf32, #tpu.memory_space<vmem>>, vector<8x32xf32>,
    return
  }
  func.func @transform_0(%arg0: i32) -> (i32, i32) {
    %c0_i32 = arith.constant 0 : i32
    %c0_i32_0 = arith.constant 0 : i32
    %c0_i32_1 = arith.constant 0 : i32
    return %c0_i32, %c0_i32_0 : i32, i32
  }
  func.func @transform_1(%arg0: i32) -> (i32, i32) {
    %c0_i32 = arith.constant 0 : i32
    %c0_i32_0 = arith.constant 0 : i32
    %c0_i32_1 = arith.constant 0 : i32
    return %c0_i32, %c0_i32_0 : i32, i32
  }
  func.func @transform_2(%arg0: i32) -> (i32, i32) {
    %c0_i32 = arith.constant 0 : i32
    %c0_i32_0 = arith.constant 0 : i32
    %c0_i32_1 = arith.constant 0 : i32
    return %c0_i32, %c0_i32_0 : i32, i32
  }
  func.func @transform_3(%arg0: i32) -> (i32, i32) {
    %c0_i32 = arith.constant 0 : i32
    %c0_i32_0 = arith.constant 0 : i32
    %c0_i32_1 = arith.constant 0 : i32
    return %c0_i32, %c0_i32_0 : i32, i32
  }
  func.func @transform_4(%arg0: i32) -> (i32, i32) {
    %c0_i32 = arith.constant 0 : i32
    %c0_i32_0 = arith.constant 0 : i32
    %c0_i32_1 = arith.constant 0 : i32
    return %c0_i32, %c0_i32_0 : i32, i32
  }
}

</mosaic_0001>

<bundles_post_ra>
// kernel: hof_forward_pallas.1
= control target key start
LH: loop header
LB: loop body
LE: loop exit
PB: predicated region body
PF: predicated region fallthrough
CT: control target
= control target key end

     0   :  { %9 = vsyncpa [#allocation3], 0  ;;  %s1808_s0 = inlined_call_operand.hbm [shape: f32[8,32], index: 0, kind: input, shape index: {}]   ;;  %s1809_s1 = inlined_call_operand.hbm [shape: f32[64,64], index: 1, kind: input, shape index: {}]   ;;  %s1810_s2 = inlined_call_operand.hbm [shape: f32[576,128], index: 2, kind: input, shape index: {}]   ;;  %s1811_s3 = inlined_call_operand.hbm [shape: f32[16,128], index: 3, kind: input, shape index: {}]   ;;  %s1812_s4 = inlined_call_operand.hbm [shape: f32[8,32], index: 4, kind: output, shape index: {}]  }
   0x1   :  { %10 = vsyncpa [#allocation6], 0 }
   0x2   :  { %11 = vsyncpa [#allocation9], 0  ;;  %s28_s17 = sshll.u32 %s1809_s1, 4  ;;  %s29_s17 = int_to_ptr.hbm [resolvable:$true] %s28_s17 }
   0x3   :  { %12 = vsyncpa [#allocation4], 0  ;;  %s1480_s18 = smov [#allocation5]   ;;  %s18_s22 = sshll.u32 %s1808_s0, 4  ;;  %s19_s22 = int_to_ptr.hbm [resolvable:$true] %s18_s22 }
   0x4   :  { %s30_s19 = sshll.u32 %s1480_s18, 4  ;;  %s1481_s23 = smov 128   ;;  %s31_s19 = int_to_ptr.vmem [resolvable:$true] %s30_s19 }
   0x5   :  { %s1482_s24 = smov 8   ;;  %s1483_s25 = smov [#allocation2]  }
   0x6   :  { %36 = dma.hbm_to_vmem [thread:$0]  %s29_s17, 1024, %s31_s19, [#allocation6], %s1481_s23, %s1481_s23, %s1482_s24  }
   0x7   :  { %s20_s26 = sshll.u32 %s1483_s25, 4  ;;  %s41_s29 = sshll.u32 %s1810_s2, 4  ;;  %s21_s26 = int_to_ptr.vmem [resolvable:$true] %s20_s26  ;;  %s42_s29 = int_to_ptr.hbm [resolvable:$true] %s41_s29 }
   0x8   :  { %23 = dma.hbm_to_vmem [thread:$0]  %s19_s22, 128, %s21_s26, [#allocation3]  }
   0x9   :  { %s54_s5 = sshll.u32 %s1811_s3, 4  ;;  %s1484_s6 = smov [#allocation7]   ;;  %s55_s5 = int_to_ptr.hbm [resolvable:$true] %s54_s5 }
   0xa   :  { %s43_s7 = sshll.u32 %s1484_s6, 4  ;;  %s1485_s0 = smov [#allocation8]   ;;  %s44_s7 = int_to_ptr.vmem [resolvable:$true] %s43_s7 }
   0xb   :  { %49 = dma.hbm_to_vmem [thread:$0]  %s42_s29, 9216, %s44_s7, [#allocation6], %s1481_s23, %s1481_s23, %s1482_s24  }
   0xc   :  { %s56_s8 = sshll.u32 %s1485_s0, 4  ;;  %s57_s8 = int_to_ptr.vmem [resolvable:$true] %s56_s8 }
   0xd   :  { %62 = dma.hbm_to_vmem [thread:$0]  %s55_s5, 256, %s57_s8, [#allocation9], %s1481_s23, %s1481_s23, %s1482_s24  }
   0xe   :  { %1472 = dma.done.wait [#allocation3], 128  }
   0xf   :  { %1473 = vsyncadd [#allocation3], 4294967168 }
  0x10   :  { %1474 = dma.done.wait [#allocation6], 10240  }
  0x11   :  { %1475 = vsyncadd [#allocation6], 4294957056 }
  0x12   :  { %1476 = dma.done.wait [#allocation9], 256  }
  0x13   :  { %1477 = vsyncadd [#allocation9], 4294967040  ;;  %v176_v0 = vld [vmem:[#allocation7 + $0x18] sm:$0xff]  ;;  %v175_v1 = vld [vmem:[#allocation7 + $0x10] sm:$0xff]  ;;  %vm179_vm0 = vcmask 261120   ;;  %vm214_vm1 = vcmask 523264   ;;  %v88_v38 = vlaneseq }
  0x14   :  { %195 = vmatpush.msra.mxu0 %v176_v0  ;;  %v303_v2 = vld [vmem:[#allocation7 + $0x138] sm:$0xff]  ;;  %v174_v3 = vld [vmem:[#allocation7 + $0x8] sm:$0xff]  ;;  %v302_v4 = vld [vmem:[#allocation7 + $0x130] sm:$0xff]  ;;  %v1486_v55 = vmov 0.0   ;;  %vm324_vm3 = vcmask 64512   ;;  %s1487_s2 = smov 48  }
  0x15   :  { %304 = vmatpush.msra.mxu2 %v303_v2  ;;  %v301_v5 = vld [vmem:[#allocation7 + $0x128] sm:$0xff]  ;;  %v173_v6 = vld [vmem:[#allocation7] sm:$0xff]  ;;  %v79_v7 = vld [vmem:[#allocation2] sm:$0xff]  ;;  %v1537_v42 = vshrl.u32 %v88_v38, 7  ;;  %v1539_v43 = vand.u32 127, %v88_v38  ;;  %s1488_s3 = smov 64  }
  0x16   :  { %196 = vmatpush.msra.mxu0 %v175_v1  ;;  %v300_v8 = vld [vmem:[#allocation7 + $0x120] sm:$0xff]  ;;  %v299_v9 = vld [vmem:[#allocation7 + $0x118] sm:$0xff]  ;;  %v298_v10 = vld [vmem:[#allocation7 + $0x110] sm:$0xff]  ;;  %s1489_s9 = smov 120   ;;  %s1492_s10 = smov [#allocation10]  }
  0x17   :  { %305 = vmatpush.msra.mxu2 %v302_v4  ;;  %v297_v11 = vld [vmem:[#allocation7 + $0x108] sm:$0xff]  ;;  %v296_v12 = vld [vmem:[#allocation7 + $0x100] sm:$0xff]  ;;  %v295_v13 = vld [vmem:[#allocation7 + $0xf8] sm:$0xff]  ;;  %v99_v45 = vand.u32 4294967288, %v1537_v42  ;;  %v1543_v46 = vmul.u32 8, %v1539_v43  ;;  %v1550_v52 = vadd.s32 8, %v1537_v42 }
  0x18   :  { %197 = vmatpush.msra.mxu0 %v174_v3  ;;  %v294_v14 = vld [vmem:[#allocation7 + $0xf0] sm:$0xff]  ;;  %v293_v15 = vld [vmem:[#allocation7 + $0xe8] sm:$0xff]  ;;  %v292_v16 = vld [vmem:[#allocation7 + $0xe0] sm:$0xff]  ;;  %v1562_v63 = vadd.s32 16, %v1537_v42  ;;  %v1575_v4 = vadd.s32 24, %v1537_v42  ;;  %s1195_s11 = sshll.u32 %s1492_s10, 4  ;;  %s1196_s11 = int_to_ptr.vmem [resolvable:$true] %s1195_s11 }
  0x19   :  { %306 = vmatpush.msra.mxu2 %v301_v5  ;;  %v291_v17 = vld [vmem:[#allocation7 + $0xd8] sm:$0xff]  ;;  %v290_v18 = vld [vmem:[#allocation7 + $0xd0] sm:$0xff]  ;;  %v289_v19 = vld [vmem:[#allocation7 + $0xc8] sm:$0xff]  ;;  %vm108_vm2 = vcmp.eq.s32.totalorder %v99_v45, %v1543_v46  ;;  %v100_v60 = vand.u32 4294967288, %v1550_v52  ;;  %v133_v45 = vand.u32 7, %v1550_v52  ;;  %s1197_s14 = sshll.u32 %s1812_s4, 4  ;;  %s1198_s14 = int_to_ptr.hbm [resolvable:$true] %s1197_s14 }
  0x1a   :  { %198 = vmatpush.msra.mxu0 %v173_v6  ;;  %v288_v20 = vld [vmem:[#allocation7 + $0xc0] sm:$0xff]  ;;  %v211_v21 = vld [vmem:[#allocation7 + $0x78] sm:$0xff]  ;;  %v210_v22 = vld [vmem:[#allocation7 + $0x70] sm:$0xff]  ;;  %v1209_v56 = vsel %vm108_vm2, 1.0, %v1486_v55  ;;  %v101_v1 = vand.u32 4294967288, %v1562_v63 }
  0x1b   :  { %1227 = vmatmul.msk.f32.vlgmr.msra.gmra.mxu0 %vm179_vm0, %v79_v7  ;;  %307 = vmatpush.msra.mxu2 %v300_v8  ;;  %v209_v23 = vld [vmem:[#allocation7 + $0x68] sm:$0xff]  ;;  %v208_v24 = vld [vmem:[#allocation7 + $0x60] sm:$0xff]  ;;  %v207_v25 = vld [vmem:[#allocation7 + $0x58] sm:$0xff]  ;;  %vm109_vm4 = vcmp.eq.s32.totalorder %v100_v60, %v1543_v46  ;;  %v102_v7 = vand.u32 4294967288, %v1575_v4  ;;  %v1586_v8 = vadd.s32 32, %v1537_v42  ;;  %vm141_vm12 = vcmp.eq.s32.totalorder %v133_v45, %v1539_v43 }
  0x1c   :  { %247 = vmatpush.msra.mxu1 %v211_v21  ;;  %v206_v26 = vld [vmem:[#allocation7 + $0x50] sm:$0xff]  ;;  %v205_v27 = vld [vmem:[#allocation7 + $0x48] sm:$0xff]  ;;  %v204_v28 = vld [vmem:[#allocation7 + $0x40] sm:$0xff]  ;;  %v1210_v0 = vsel %vm109_vm4, 1.0, %v1486_v55  ;;  %vm110_vm5 = vcmp.eq.s32.totalorder %v101_v1, %v1543_v46 }
  0x1d   :  { %308 = vmatpush.msra.mxu2 %v299_v9  ;;  %v80_v29 = vld [vmem:[#allocation5] sm:$0xff]  ;;  %v81_v30 = vld [vmem:[#allocation5 + $0x8] sm:$0xff]  ;;  %v82_v34 = vld [vmem:[#allocation5 + $0x10] sm:$0xff]  ;;  %v1211_v6 = vsel %vm110_vm5, 1.0, %v1486_v55  ;;  %vm111_vm6 = vcmp.eq.s32.totalorder %v102_v7, %v1543_v46 }
  0x1e   :  { %248 = vmatpush.msra.mxu1 %v210_v22  ;;  %v1302_v31 = vld [vmem:[#allocation8] ss:$0 sm:$0xff]  ;;  %v83_v36 = vld [vmem:[#allocation5 + $0x18] sm:$0xff]  ;;  %v85_v39 = vld [vmem:[#allocation5 + $0x28] sm:$0xff]  ;;  %v1212_v9 = vsel %vm111_vm6, 1.0, %v1486_v55 }
  0x1f   :  { %309 = vmatpush.msra.mxu2 %v298_v10  ;;  %v84_v37 = vld [vmem:[#allocation5 + $0x20] sm:$0xff]  ;;  %v466_v40 = vld [vmem:[#allocation7 + $0x1f8] sm:$0xff]  ;;  %v465_v41 = vld [vmem:[#allocation7 + $0x1f0] sm:$0xff]  ;;  %v103_v10 = vand.u32 4294967288, %v1586_v8 }
  0x20   :  { %249 = vmatpush.msra.mxu1 %v209_v23  ;;  %v464_v44 = vld [vmem:[#allocation7 + $0x1e8] sm:$0xff]  ;;  %v86_v47 = vld [vmem:[#allocation5 + $0x30] sm:$0xff]  ;;  %v463_v48 = vld [vmem:[#allocation7 + $0x1e0] sm:$0xff]  ;;  %v96_v23 = vadd.s32 56, %v1537_v42 }
  0x21   :  { %310 = vmatpush.msra.mxu2 %v297_v11  ;;  %v462_v49 = vld [vmem:[#allocation7 + $0x1d8] sm:$0xff]  ;;  %v1545_v50 = vld [vmem:[#allocation8 + $0x2] ss:$0 sm:$0xff]  ;;  %v461_v53 = vld [vmem:[#allocation7 + $0x1d0] sm:$0xff]  ;;  %vm112_vm7 = vcmp.eq.s32.totalorder %v103_v10, %v1543_v46  ;;  %v1593_v11 = vadd.s32 40, %v1537_v42 }
  0x22   :  { %250 = vmatpush.msra.mxu1 %v208_v24  ;;  %v460_v57 = vld [vmem:[#allocation7 + $0x1c8] sm:$0xff]  ;;  %v87_v59 = vld [vmem:[#allocation5 + $0x38] sm:$0xff]  ;;  %v459_v62 = vld [vmem:[#allocation7 + $0x1c0] sm:$0xff] }
  0x23   :  { %311 = vmatpush.msra.mxu2 %v296_v12  ;;  %v1213_v12 = vsel %vm112_vm7, 1.0, %v1486_v55  ;;  %v839_v24 = vld [vmem:[#allocation7 + $0xa8] sm:$0xff]  ;;  %v137_v10 = vand.u32 7, %v1593_v11 }
  0x24   :  { %251 = vmatpush.msra.mxu1 %v207_v25  ;;  %v106_v25 = vand.u32 4294967288, %v96_v23 }
  0x25   :  { %312 = vmatpush.msra.mxu2 %v295_v13  ;;  %v104_v13 = vand.u32 4294967288, %v1593_v11  ;;  %vm145_vm5 = vcmp.eq.s32.totalorder %v137_v10, %v1539_v43 }
  0x26   :  { %252 = vmatpush.msra.mxu1 %v206_v26  ;;  %v838_v26 = vld [vmem:[#allocation7 + $0xa0] sm:$0xff]  ;;  %vm115_vm10 = vcmp.eq.s32.totalorder %v106_v25, %v1543_v46 }
  0x27   :  { %313 = vmatpush.msra.mxu2 %v294_v14  ;;  %vm113_vm8 = vcmp.eq.s32.totalorder %v104_v13, %v1543_v46 }
  0x28   :  { %253 = vmatpush.msra.mxu1 %v205_v27  ;;  %v1214_v14 = vsel %vm113_vm8, 1.0, %v1486_v55  ;;  %v837_v27 = vld [vmem:[#allocation7 + $0x98] sm:$0xff] }
  0x29   :  { %314 = vmatpush.msra.mxu2 %v293_v15  ;;  %v95_v15 = vadd.s32 48, %v1537_v42 }
  0x2a   :  { %254 = vmatpush.msra.mxu1 %v204_v28  ;;  %v1216_v28 = vsel %vm115_vm10, 1.0, %v1486_v55 }
  0x2b   :  { %315 = vmatpush.msra.mxu2 %v292_v16  ;;  %1228 = vmatmul.msk.f32.vlgmr.msra.gmra.mxu1 %vm214_vm1, %v80_v29  ;;  %v105_v16 = vand.u32 4294967288, %v95_v15 }
  0x2d   :  { %316 = vmatpush.msra.mxu2 %v291_v17  ;;  %v841_v17 = vld [vmem:[#allocation7 + $0xb8] sm:$0xff]  ;;  %vm114_vm9 = vcmp.eq.s32.totalorder %v105_v16, %v1543_v46 }
  0x2e   :  { %v1215_v21 = vsel %vm114_vm9, 1.0, %v1486_v55 }
  0x2f   :  { %317 = vmatpush.msra.mxu2 %v290_v18 }
  0x31   :  { %318 = vmatpush.msra.mxu2 %v289_v19 }
  0x33   :  { %319 = vmatpush.msra.mxu2 %v288_v20  ;;  %1229 = vmatmul.msk.f32.gmra.mxu1 %vm214_vm1, %v81_v30  ;;  %v840_v20 = vld [vmem:[#allocation7 + $0xb0] sm:$0xff] }
  0x34   :  { %v836_v30 = vld [vmem:[#allocation7 + $0x90] sm:$0xff] }
  0x35   :  { %499 = vmatpush.msrb.mxu2 %v466_v40 }
  0x37   :  { %500 = vmatpush.msrb.mxu2 %v465_v41 }
  0x39   :  { %501 = vmatpush.msrb.mxu2 %v464_v44 }
  0x3b   :  { %1230 = vmatmul.msk.f32.gmra.mxu1 %vm214_vm1, %v82_v34  ;;  %502 = vmatpush.msrb.mxu2 %v463_v48  ;;  %v834_v34 = vld [vmem:[#allocation7 + $0x80] sm:$0xff] }
  0x3d   :  { %503 = vmatpush.msrb.mxu2 %v462_v49  ;;  %v138_v49 = vand.u32 7, %v95_v15 }
  0x3f   :  { %504 = vmatpush.msrb.mxu2 %v461_v53  ;;  %v134_v53 = vand.u32 7, %v1562_v63  ;;  %vm146_vm13 = vcmp.eq.s32.totalorder %v138_v49, %v1539_v43  ;;  %v135_v63 = vand.u32 7, %v1575_v4 }
  0x40   :  { %v1223_v52 = vsel %vm146_vm13, 1.0, %v1486_v55 }
  0x41   :  { %505 = vmatpush.msrb.mxu2 %v460_v57  ;;  %v139_v57 = vand.u32 7, %v96_v23  ;;  %vm142_vm14 = vcmp.eq.s32.totalorder %v134_v53, %v1539_v43  ;;  %vm143_vm2 = vcmp.eq.s32.totalorder %v135_v63, %v1539_v43 }
  0x42   :  { %v1219_v60 = vsel %vm142_vm14, 1.0, %v1486_v55  ;;  %v1220_v4 = vsel %vm143_vm2, 1.0, %v1486_v55 }
  0x43   :  { %1231 = vmatmul.msk.f32.gmra.mxu1 %vm214_vm1, %v83_v36  ;;  %506 = vmatpush.msrb.mxu2 %v459_v62  ;;  %vm147_vm15 = vcmp.eq.s32.totalorder %v139_v57, %v1539_v43 }
  0x44   :  { %v1224_v62 = vsel %vm147_vm15, 1.0, %v1486_v55 }
  0x4b   :  { %1232 = vmatmul.msk.f32.gmra.mxu1 %vm214_vm1, %v84_v37  ;;  %v132_v37 = vand.u32 7, %v1537_v42 }
  0x4d   :  { %vm140_vm11 = vcmp.eq.s32.totalorder %v132_v37, %v1539_v43 }
  0x4e   :  { %v1217_v41 = vsel %vm140_vm11, 1.0, %v1486_v55 }
  0x53   :  { %1233 = vmatmul.msk.f32.gmra.mxu1 %vm214_vm1, %v85_v39 }
  0x5b   :  { %1234 = vmatmul.msk.f32.gmra.mxu1 %vm214_vm1, %v86_v47 }
  0x63   :  { %1235 = vmatmul.msk.f32.gmra.mxu1 %vm214_vm1, %v87_v59 }
  0x98   :  { %v200_v32 = vpop.f32.mrf.mxu0 }
  0x99   :  { %v201_v33 = vadd.f32 %v1302_v31, %v200_v32 }
  0x9b   :  { %v203_v35 = vmax.f32 %v201_v33, 0.0  ;;  %v835_v33 = vld [vmem:[#allocation7 + $0x88] sm:$0xff] }
  0x9d   :  { %320 = vmatmul.f32.vlgmr.msra.gmra.mxu2 %v203_v35 }
  0xa8   :  { %v256_v51 = vpop.f32.mrf.mxu1 }
  0xa9   :  { %v1553_v54 = vadd.f32 %v1545_v50, %v256_v51  ;;  %v1218_v51 = vsel %vm141_vm12, 1.0, %v1486_v55 }
  0xab   :  { %v280_v61 = vmax.f32 %v1553_v54, 0.0 }
  0xad   :  { %1252 = vmatmul.msk.f32.vlgmr.msrb.gmra.mxu2 %vm214_vm1, %v280_v61 }
  0xb0   :  { %v259_v2 = vpop.f32.mrf.mxu1 }
  0xb1   :  { %v1571_v3 = vadd.f32 %v1545_v50, %v259_v2 }
  0xb3   :  { %v281_v5 = vmax.f32 %v1571_v3, 0.0 }
  0xb5   :  { %1253 = vmatmul.msk.f32.gmra.mxu2 %vm214_vm1, %v281_v5 }
  0xb8   :  { %v262_v18 = vpop.f32.mrf.mxu1 }
  0xb9   :  { %v1604_v19 = vadd.f32 %v1545_v50, %v262_v18 }
  0xbb   :  { %v282_v22 = vmax.f32 %v1604_v19, 0.0 }
  0xbd   :  { %1254 = vmatmul.msk.f32.gmra.mxu2 %vm214_vm1, %v282_v22 }
  0xc0   :  { %v265_v29 = vpop.f32.mrf.mxu1 }
  0xc1   :  { %v1617_v31 = vadd.f32 %v1545_v50, %v265_v29 }
  0xc3   :  { %v283_v32 = vmax.f32 %v1617_v31, 0.0 }
  0xc5   :  { %1255 = vmatmul.msk.f32.gmra.mxu2 %vm214_vm1, %v283_v32 }
  0xc8   :  { %v268_v35 = vpop.f32.mrf.mxu1 }
  0xc9   :  { %v1624_v36 = vadd.f32 %v1545_v50, %v268_v35 }
  0xcb   :  { %v284_v38 = vmax.f32 %v1624_v36, 0.0 }
  0xcd   :  { %1256 = vmatmul.msk.f32.gmra.mxu2 %vm214_vm1, %v284_v38 }
  0xd0   :  { %v271_v39 = vpop.f32.mrf.mxu1 }
  0xd1   :  { %v1633_v40 = vadd.f32 %v1545_v50, %v271_v39 }
  0xd3   :  { %v285_v46 = vmax.f32 %v1633_v40, 0.0 }
  0xd5   :  { %1257 = vmatmul.msk.f32.gmra.mxu2 %vm214_vm1, %v285_v46 }
  0xd8   :  { %v274_v47 = vpop.f32.mrf.mxu1 }
  0xd9   :  { %v275_v48 = vadd.f32 %v1545_v50, %v274_v47 }
 0x120   :  { %v321_v58 = vpop.f32.mrf.mxu2 }
 0x121   :  { %391 = vrot.lane.b32.xlu0 %v321_v58, %s1487_s2  ;;  %364 = vmatpush.msra.mxu3 %v321_v58  ;;  %v277_v58 = vpop.f32.mrf.mxu1 }
 0x122   :  { %1236 = vmatmul.msk.f32.vlgmr.msra.gmra.mxu3 %vm324_vm3, %v1209_v56  ;;  %v286_v56 = vmax.f32 %v275_v48, 0.0  ;;  %v278_v59 = vadd.f32 %v1545_v50, %v277_v58 }
 0x123   :  { %876 = vmatpush.msrb.mxu3 %v841_v17 }
 0x124   :  { %1258 = vmatmul.msk.f32.gmra.mxu2 %vm214_vm1, %v286_v56 }
 0x125   :  { %877 = vmatpush.msrb.mxu3 %v840_v20 }
 0x127   :  { %878 = vmatpush.msrb.mxu3 %v839_v24 }
 0x129   :  { %879 = vmatpush.msrb.mxu3 %v838_v26 }
 0x12a   :  { %1237 = vmatmul.msk.f32.gmra.mxu3 %vm324_vm3, %v1210_v0  ;;  %v287_v0 = vmax.f32 %v278_v59, 0.0 }
 0x12b   :  { %880 = vmatpush.msrb.mxu3 %v837_v27 }
 0x12c   :  { %1259 = vmatmul.msk.f32.gmra.mxu2 %vm214_vm1, %v287_v0 }
 0x12d   :  { %881 = vmatpush.msrb.mxu3 %v836_v30 }
 0x12f   :  { %882 = vmatpush.msrb.mxu3 %v835_v33 }
 0x130   :  { %v508_v50 = vpop.f32.mrf.mxu2 }
 0x131   :  { %883 = vmatpush.msrb.mxu3 %v834_v34  ;;  %580 = vrot.lane.b32.xlu1 %v508_v50, %s1488_s3 }
 0x132   :  { %1238 = vmatmul.msk.f32.gmra.mxu3 %vm324_vm3, %v1211_v6  ;;  %v136_v6 = vand.u32 7, %v1586_v8 }
 0x134   :  { %vm144_vm4 = vcmp.eq.s32.totalorder %v136_v6, %v1539_v43 }
 0x138   :  { %v511_v17 = vpop.f32.mrf.mxu2 }
 0x13a   :  { %1239 = vmatmul.msk.f32.gmra.mxu3 %vm324_vm3, %v1212_v9  ;;  %v1221_v9 = vsel %vm144_vm4, 1.0, %v1486_v55 }
 0x140   :  { %v514_v20 = vpop.f32.mrf.mxu2 }
 0x142   :  { %1240 = vmatmul.msk.f32.gmra.mxu3 %vm324_vm3, %v1213_v12 }
 0x148   :  { %v517_v25 = vpop.f32.mrf.mxu2 }
 0x14a   :  { %1241 = vmatmul.msk.f32.gmra.mxu3 %vm324_vm3, %v1214_v14 }
 0x150   :  { %v520_v27 = vpop.f32.mrf.mxu2 }
 0x152   :  { %1242 = vmatmul.msk.f32.gmra.mxu3 %vm324_vm3, %v1215_v21 }
 0x158   :  { %v523_v29 = vpop.f32.mrf.mxu2 }
 0x15a   :  { %1243 = vmatmul.msk.f32.gmra.mxu3 %vm324_vm3, %v1216_v28 }
 0x193   :  { %v392_v44 = vpop.permute.xlu0 %391 }
 0x194   :  { %433 = vmatpush.msrb.mxu0 %v392_v44  ;;  %1288 = vmatpush.msrb.mxu1 %v392_v44 }
 0x195   :  { %1244 = vmatmul.msk.f32.vlgmr.msrb.gmra.mxu0 %vm324_vm3, %v1217_v41  ;;  %1250 = vmatmul.msk.f32.vlgmr.msrb.gmra.mxu1 %vm324_vm3, %v1223_v52 }
 0x19d   :  { %1245 = vmatmul.msk.f32.gmra.mxu0 %vm324_vm3, %v1218_v51  ;;  %1251 = vmatmul.msk.f32.gmra.mxu1 %vm324_vm3, %v1224_v62 }
 0x1a3   :  { %v581_v36 = vpop.permute.xlu1 %580 }
 0x1a5   :  { %v1655_v1 = vpop.f32.mrf.mxu3  ;;  %1246 = vmatmul.msk.f32.gmra.mxu0 %vm324_vm3, %v1219_v60 }
 0x1a6   :  { %v826_v2 = vmul.f32 %v1655_v1, %v280_v61  ;;  %v1304_v61 = vld [vmem:[#allocation8 + $0x4] ss:$0 sm:$0xff] }
 0x1a7   :  { %615 = vrot.lane.b32.xlu1 %v1304_v61, %s1488_s3 }
 0x1a8   :  { %1268 = vmatmul.msk.f32.vlgmr.msrb.gmra.mxu3 %vm214_vm1, %v826_v2 }
 0x1ad   :  { %1247 = vmatmul.msk.f32.gmra.mxu0 %vm324_vm3, %v1220_v4  ;;  %v369_v7 = vpop.f32.mrf.mxu3 }
 0x1ae   :  { %v827_v54 = vmul.f32 %v369_v7, %v281_v5  ;;  %v1222_v5 = vsel %vm145_vm5, 1.0, %v1486_v55 }
 0x1af   :  { %584 = vrot.lane.b32.xlu1 %v514_v20, %s1488_s3 }
 0x1b0   :  { %1269 = vmatmul.msk.f32.gmra.mxu3 %vm214_vm1, %v827_v54 }
 0x1b5   :  { %1248 = vmatmul.msk.f32.gmra.mxu0 %vm324_vm3, %v1221_v9  ;;  %v1677_v8 = vpop.f32.mrf.mxu3 }
 0x1b6   :  { %v828_v3 = vmul.f32 %v1677_v8, %v282_v22 }
 0x1b8   :  { %1270 = vmatmul.msk.f32.gmra.mxu3 %vm214_vm1, %v828_v3 }
 0x1bd   :  { %1249 = vmatmul.msk.f32.gmra.mxu0 %vm324_vm3, %v1222_v5  ;;  %v1686_v12 = vpop.f32.mrf.mxu3 }
 0x1be   :  { %v829_v11 = vmul.f32 %v1686_v12, %v283_v32  ;;  %v526_v32 = vpop.f32.mrf.mxu2 }
 0x1c0   :  { %1271 = vmatmul.msk.f32.gmra.mxu3 %vm214_vm1, %v829_v11 }
 0x1c5   :  { %v1692_v13 = vpop.f32.mrf.mxu3 }
 0x1c6   :  { %v830_v14 = vmul.f32 %v1692_v13, %v284_v38  ;;  %v529_v35 = vpop.f32.mrf.mxu2 }
 0x1c8   :  { %1272 = vmatmul.msk.f32.gmra.mxu3 %vm214_vm1, %v830_v14 }
 0x1cd   :  { %v1698_v15 = vpop.f32.mrf.mxu3 }
 0x1ce   :  { %v831_v16 = vmul.f32 %v1698_v15, %v285_v46 }
 0x1d0   :  { %1273 = vmatmul.msk.f32.gmra.mxu3 %vm214_vm1, %v831_v16 }
 0x1d5   :  { %v1702_v18 = vpop.f32.mrf.mxu3 }
 0x1d6   :  { %v832_v19 = vmul.f32 %v1702_v18, %v286_v56 }
 0x1d8   :  { %1274 = vmatmul.msk.f32.gmra.mxu3 %vm214_vm1, %v832_v19 }
 0x1dd   :  { %v1706_v21 = vpop.f32.mrf.mxu3 }
 0x1de   :  { %v833_v22 = vmul.f32 %v1706_v21, %v287_v0 }
 0x1e0   :  { %1275 = vmatmul.msk.f32.gmra.mxu3 %vm214_vm1, %v833_v22 }
 0x212   :  { %v435_v23 = vpop.f32.mrf.mxu0  ;;  %v453_v31 = vpop.f32.mrf.mxu1 }
 0x213   :  { %540 = vrot.lane.b32.xlu0 %v435_v23, %s1488_s3 }
 0x219   :  { %v1725_v40 = vpop.permute.xlu1 %615 }
 0x21a   :  { %v438_v24 = vpop.f32.mrf.mxu0  ;;  %v456_v34 = vpop.f32.mrf.mxu1 }
 0x21b   :  { %542 = vrot.lane.b32.xlu2 %v438_v24, %s1488_s3 }
 0x221   :  { %v585_v62 = vpop.permute.xlu1 %584 }
 0x222   :  { %v441_v26 = vpop.f32.mrf.mxu0 }
 0x223   :  { %544 = vrot.lane.b32.xlu0 %v441_v26, %s1488_s3  ;;  %582 = vrot.lane.b32.xlu2 %v511_v17, %s1488_s3 }
 0x22a   :  { %v444_v28 = vpop.f32.mrf.mxu0 }
 0x22b   :  { %586 = vrot.lane.b32.xlu0 %v517_v25, %s1488_s3  ;;  %546 = vrot.lane.b32.xlu2 %v444_v28, %s1488_s3 }
 0x232   :  { %v447_v30 = vpop.f32.mrf.mxu0 }
 0x233   :  { %548 = vrot.lane.b32.xlu1 %v447_v30, %s1488_s3  ;;  %588 = vrot.lane.b32.xlu2 %v520_v27, %s1488_s3 }
 0x23a   :  { %v450_v33 = vpop.f32.mrf.mxu0 }
 0x23b   :  { %550 = vrot.lane.b32.xlu0 %v450_v33, %s1488_s3  ;;  %590 = vrot.lane.b32.xlu1 %v523_v29, %s1488_s3 }
 0x23c   :  { %552 = vrot.lane.b32.xlu2 %v453_v31, %s1488_s3 }
 0x243   :  { %554 = vrot.lane.b32.xlu1 %v456_v34, %s1488_s3  ;;  %592 = vrot.lane.b32.xlu0 %v526_v32, %s1488_s3 }
 0x244   :  { %594 = vrot.lane.b32.xlu2 %v529_v35, %s1488_s3 }
 0x275   :  { %v543_v37 = vpop.permute.xlu2 %542 }
 0x276   :  { %v565_v38 = vadd.f32 %v543_v37, %v369_v7 }
 0x27d   :  { %v583_v39 = vpop.permute.xlu2 %582 }
 0x27e   :  { %v605_v41 = vadd.f32 %v583_v39, %v565_v38 }
 0x280   :  { %v619_v44 = vadd.f32 %v1725_v40, %v605_v41 }
 0x282   :  { %v1261_v45 = vmul.f32 -1.442695, %v619_v44 }
 0x284   :  { %1313 = vpow2.f32 %v1261_v45 }
 0x285   :  { %v541_v46 = vpop.permute.xlu0 %540  ;;  %v547_v2 = vpop.permute.xlu2 %546 }
 0x286   :  { %v564_v47 = vadd.f32 %v541_v46, %v1655_v1  ;;  %v567_v54 = vadd.f32 %v547_v2, %v1686_v12 }
 0x288   :  { %v604_v48 = vadd.f32 %v581_v36, %v564_v47 }
 0x28a   :  { %v1314_v49 = vpop.eup %1313  ;;  %v618_v51 = vadd.f32 %v1725_v40, %v604_v48 }
 0x28b   :  { %v651_v53 = vadd.f32 1.0, %v1314_v49 }
 0x28c   :  { %v1260_v56 = vmul.f32 -1.442695, %v618_v51 }
 0x28d   :  { %1315 = vrcp.f32 %v651_v53  ;;  %vm678_vm6 = vweird.f32 %v651_v53  ;;  %v684_v1 = vand.u32 2147483648, %v651_v53  ;;  %v682_v6 = vand.u32 2147483647, %v651_v53  ;;  %v589_v28 = vpop.permute.xlu2 %588 }
 0x28e   :  { %1317 = vpow2.f32 %v1260_v56 }
 0x28f   :  { %v685_v9 = vor.u32 1.1754944e-38, %v684_v1  ;;  %vm683_vm9 = vcmp.eq.f32.partialorder %v682_v6, 8.507059e+37 }
 0x293   :  { %v1316_v52 = vpop.eup %1315 }
 0x294   :  { %v1318_v57 = vpop.eup %1317  ;;  %v674_v58 = vmul.f32 %v1316_v52, %v651_v53  ;;  %vm679_vm7 = vweird.f32 %v1316_v52 }
 0x295   :  { %v650_v59 = vadd.f32 1.0, %v1318_v57  ;;  %v545_v60 = vpop.permute.xlu0 %544  ;;  %vm680_vm8 = vmor %vm678_vm6, %vm679_vm7 }
 0x296   :  { %v566_v63 = vadd.f32 %v545_v60, %v1677_v8  ;;  %v675_v0 = vsub.f32 1.0, %v674_v58  ;;  %v553_v46 = vpop.permute.xlu2 %552 }
 0x297   :  { %1319 = vrcp.f32 %v650_v59  ;;  %v669_v19 = vand.u32 2147483648, %v650_v59  ;;  %v667_v23 = vand.u32 2147483647, %v650_v59  ;;  %vm663_vm11 = vweird.f32 %v650_v59 }
 0x298   :  { %v606_v50 = vadd.f32 %v585_v62, %v566_v63  ;;  %v676_v4 = vmul.f32 %v1316_v52, %v675_v0  ;;  %v570_v48 = vadd.f32 %v553_v46, %v1702_v18 }
 0x299   :  { %v670_v29 = vor.u32 1.1754944e-38, %v669_v19  ;;  %vm668_vm13 = vcmp.eq.f32.partialorder %v667_v23, 8.507059e+37 }
 0x29a   :  { %v620_v7 = vadd.f32 %v1725_v40, %v606_v50  ;;  %v677_v61 = vadd.f32 %v1316_v52, %v676_v4 }
 0x29c   :  { %v1262_v10 = vmul.f32 -1.442695, %v620_v7  ;;  %v681_v3 = vsel %vm680_vm8, %v1316_v52, %v677_v61 }
 0x29d   :  { %v1320_v8 = vpop.eup %1319  ;;  %v587_v5 = vpop.permute.xlu0 %586  ;;  %v1733_v11 = vsel %vm683_vm9, %v685_v9, %v681_v3 }
 0x29e   :  { %1321 = vpow2.f32 %v1262_v10  ;;  %v607_v14 = vadd.f32 %v587_v5, %v567_v54  ;;  %788 = vrot.lane.b32.xlu1 %v1733_v11, %s1489_s9  ;;  %v659_v16 = vmul.f32 %v1320_v8, %v650_v59  ;;  %vm664_vm10 = vweird.f32 %v1320_v8 }
 0x29f   :  { %vm665_vm12 = vmor %vm663_vm11, %vm664_vm10 }
 0x2a0   :  { %v621_v17 = vadd.f32 %v1725_v40, %v607_v14  ;;  %v660_v12 = vsub.f32 1.0, %v659_v16 }
 0x2a2   :  { %v1263_v20 = vmul.f32 -1.442695, %v621_v17  ;;  %v661_v22 = vmul.f32 %v1320_v8, %v660_v12 }
 0x2a4   :  { %v1322_v24 = vpop.eup %1321  ;;  %1323 = vpow2.f32 %v1263_v20  ;;  %v662_v25 = vadd.f32 %v1320_v8, %v661_v22 }
 0x2a5   :  { %v652_v26 = vadd.f32 1.0, %v1322_v24  ;;  %v549_v27 = vpop.permute.xlu1 %548 }
 0x2a6   :  { %v568_v30 = vadd.f32 %v549_v27, %v1692_v13  ;;  %v666_v31 = vsel %vm665_vm12, %v1320_v8, %v662_v25 }
 0x2a7   :  { %1325 = vrcp.f32 %v652_v26  ;;  %v1739_v32 = vsel %vm668_vm13, %v670_v29, %v666_v31  ;;  %v699_v49 = vand.u32 2147483648, %v652_v26  ;;  %v697_v56 = vand.u32 2147483647, %v652_v26 }
 0x2a8   :  { %v608_v33 = vadd.f32 %v589_v28, %v568_v30  ;;  %786 = vrot.lane.b32.xlu0 %v1739_v32, %s1489_s9  ;;  %vm693_vm15 = vweird.f32 %v652_v26 }
 0x2a9   :  { %v700_v63 = vor.u32 1.1754944e-38, %v699_v49  ;;  %vm698_vm4 = vcmp.eq.f32.partialorder %v697_v56, 8.507059e+37 }
 0x2aa   :  { %v1324_v34 = vpop.eup %1323  ;;  %v622_v35 = vadd.f32 %v1725_v40, %v608_v33 }
 0x2ab   :  { %v653_v36 = vadd.f32 1.0, %v1324_v34 }
 0x2ac   :  { %v1264_v37 = vmul.f32 -1.442695, %v622_v35 }
 0x2ad   :  { %v1326_v38 = vpop.eup %1325  ;;  %1327 = vrcp.f32 %v653_v36  ;;  %v551_v39 = vpop.permute.xlu0 %550  ;;  %v714_v4 = vand.u32 2147483648, %v653_v36  ;;  %v712_v7 = vand.u32 2147483647, %v653_v36  ;;  %vm708_vm6 = vweird.f32 %v653_v36 }
 0x2ae   :  { %1329 = vpow2.f32 %v1264_v37  ;;  %v569_v13 = vadd.f32 %v551_v39, %v1698_v15  ;;  %v689_v41 = vmul.f32 %v1326_v38, %v652_v26  ;;  %v591_v44 = vpop.permute.xlu1 %590  ;;  %vm694_vm14 = vweird.f32 %v1326_v38 }
 0x2af   :  { %vm695_vm2 = vmor %vm693_vm15, %vm694_vm14  ;;  %v715_v10 = vor.u32 1.1754944e-38, %v714_v4  ;;  %vm713_vm8 = vcmp.eq.f32.partialorder %v712_v7, 8.507059e+37 }
 0x2b0   :  { %v609_v45 = vadd.f32 %v591_v44, %v569_v13  ;;  %v690_v47 = vsub.f32 1.0, %v689_v41 }
 0x2b2   :  { %v623_v51 = vadd.f32 %v1725_v40, %v609_v45  ;;  %v691_v53 = vmul.f32 %v1326_v38, %v690_v47 }
 0x2b3   :  { %v1328_v52 = vpop.eup %1327 }
 0x2b4   :  { %v1330_v57 = vpop.eup %1329  ;;  %v1265_v58 = vmul.f32 -1.442695, %v623_v51  ;;  %v692_v59 = vadd.f32 %v1326_v38, %v691_v53  ;;  %v704_v60 = vmul.f32 %v1328_v52, %v653_v36  ;;  %vm709_vm5 = vweird.f32 %v1328_v52 }
 0x2b5   :  { %v654_v15 = vadd.f32 1.0, %v1330_v57  ;;  %v593_v62 = vpop.permute.xlu0 %592  ;;  %vm710_vm7 = vmor %vm708_vm6, %vm709_vm5 }
 0x2b6   :  { %1331 = vpow2.f32 %v1265_v58  ;;  %v610_v0 = vadd.f32 %v593_v62, %v570_v48  ;;  %v696_v2 = vsel %vm695_vm2, %v1326_v38, %v692_v59  ;;  %v705_v1 = vsub.f32 1.0, %v704_v60  ;;  %v555_v53 = vpop.permute.xlu1 %554 }
 0x2b7   :  { %1333 = vrcp.f32 %v654_v15  ;;  %v1747_v18 = vsel %vm698_vm4, %v700_v63, %v696_v2  ;;  %v729_v12 = vand.u32 2147483648, %v654_v15  ;;  %v727_v22 = vand.u32 2147483647, %v654_v15 }
 0x2b8   :  { %v624_v50 = vadd.f32 %v1725_v40, %v610_v0  ;;  %790 = vrot.lane.b32.xlu2 %v1747_v18, %s1489_s9  ;;  %v706_v6 = vmul.f32 %v1328_v52, %v705_v1  ;;  %vm723_vm10 = vweird.f32 %v654_v15  ;;  %v571_v56 = vadd.f32 %v555_v53, %v1706_v21 }
 0x2b9   :  { %v730_v26 = vor.u32 1.1754944e-38, %v729_v12  ;;  %vm728_vm12 = vcmp.eq.f32.partialorder %v727_v22, 8.507059e+37 }
 0x2ba   :  { %v1266_v54 = vmul.f32 -1.442695, %v624_v50  ;;  %v707_v61 = vadd.f32 %v1328_v52, %v706_v6 }
 0x2bc   :  { %v1332_v9 = vpop.eup %1331  ;;  %1335 = vpow2.f32 %v1266_v54  ;;  %v711_v5 = vsel %vm710_vm7, %v1328_v52, %v707_v61  ;;  %v595_v52 = vpop.permute.xlu2 %594 }
 0x2bd   :  { %v1334_v3 = vpop.eup %1333  ;;  %v655_v8 = vadd.f32 1.0, %v1332_v9  ;;  %v1752_v14 = vsel %vm713_vm8, %v715_v10, %v711_v5  ;;  %v611_v57 = vadd.f32 %v595_v52, %v571_v56 }
 0x2be   :  { %v719_v16 = vmul.f32 %v1334_v3, %v654_v15  ;;  %792 = vrot.lane.b32.xlu0 %v1752_v14, %s1489_s9  ;;  %vm724_vm9 = vweird.f32 %v1334_v3 }
 0x2bf   :  { %1337 = vrcp.f32 %v655_v8  ;;  %vm725_vm11 = vmor %vm723_vm10, %vm724_vm9  ;;  %v744_v31 = vand.u32 2147483648, %v655_v8  ;;  %v742_v34 = vand.u32 2147483647, %v655_v8  ;;  %vm738_vm14 = vweird.f32 %v655_v8 }
 0x2c0   :  { %v720_v17 = vsub.f32 1.0, %v719_v16  ;;  %v625_v58 = vadd.f32 %v1725_v40, %v611_v57 }
 0x2c1   :  { %v745_v38 = vor.u32 1.1754944e-38, %v744_v31  ;;  %vm743_vm2 = vcmp.eq.f32.partialorder %v742_v34, 8.507059e+37 }
 0x2c2   :  { %v1336_v19 = vpop.eup %1335  ;;  %v721_v20 = vmul.f32 %v1334_v3, %v720_v17  ;;  %v1267_v59 = vmul.f32 -1.442695, %v625_v58 }
 0x2c3   :  { %v656_v23 = vadd.f32 1.0, %v1336_v19 }
 0x2c4   :  { %v722_v24 = vadd.f32 %v1334_v3, %v721_v20 }
 0x2c5   :  { %v1338_v25 = vpop.eup %1337  ;;  %1339 = vrcp.f32 %v656_v23  ;;  %v759_v44 = vand.u32 2147483648, %v656_v23  ;;  %v757_v46 = vand.u32 2147483647, %v656_v23  ;;  %vm753_vm5 = vweird.f32 %v656_v23 }
 0x2c6   :  { %v726_v27 = vsel %vm725_vm11, %v1334_v3, %v722_v24  ;;  %v734_v28 = vmul.f32 %v1338_v25, %v655_v8  ;;  %vm739_vm13 = vweird.f32 %v1338_v25  ;;  %1341 = vpow2.f32 %v1267_v59 }
 0x2c7   :  { %v1756_v29 = vsel %vm728_vm12, %v730_v26, %v726_v27  ;;  %vm740_vm15 = vmor %vm738_vm14, %vm739_vm13  ;;  %v760_v48 = vor.u32 1.1754944e-38, %v759_v44  ;;  %vm758_vm7 = vcmp.eq.f32.partialorder %v757_v46, 8.507059e+37  ;;  %v168_v27 = vand.u32 4294967288, %v1539_v43 }
 0x2c8   :  { %794 = vrot.lane.b32.xlu1 %v1756_v29, %s1489_s9  ;;  %v735_v30 = vsub.f32 1.0, %v734_v28  ;;  %v169_v28 = vmul.u32 8, %v1537_v42 }
 0x2ca   :  { %v736_v33 = vmul.f32 %v1338_v25, %v735_v30  ;;  %vm170_vm12 = vcmp.eq.s32.totalorder %v168_v27, %v169_v28  ;;  %v1491_v28 = vmov 32.0  }
 0x2cb   :  { %v1340_v35 = vpop.eup %1339 }
 0x2cc   :  { %v737_v36 = vadd.f32 %v1338_v25, %v736_v33  ;;  %v749_v37 = vmul.f32 %v1340_v35, %v656_v23  ;;  %vm754_vm4 = vweird.f32 %v1340_v35  ;;  %v1342_v60 = vpop.eup %1341 }
 0x2cd   :  { %vm755_vm6 = vmor %vm753_vm5, %vm754_vm4  ;;  %v657_v15 = vadd.f32 1.0, %v1342_v60 }
 0x2ce   :  { %v741_v39 = vsel %vm740_vm15, %v1338_v25, %v737_v36  ;;  %v750_v13 = vsub.f32 1.0, %v749_v37 }
 0x2cf   :  { %v746_v41 = vsel %vm743_vm2, %v745_v38, %v741_v39  ;;  %1343 = vrcp.f32 %v657_v15  ;;  %vm768_vm9 = vweird.f32 %v657_v15  ;;  %v772_v10 = vand.u32 2147483647, %v657_v15 }
 0x2d0   :  { %796 = vrot.lane.b32.xlu2 %v746_v41, %s1489_s9  ;;  %v751_v45 = vmul.f32 %v1340_v35, %v750_v13  ;;  %v1305_v13 = vld [vmem:[#allocation8 + $0x3] ss:$0 sm:$0xff]  ;;  %1345 = vrcp.f32 %v1491_v28 }
 0x2d1   :  { %vm773_vm11 = vcmp.eq.f32.partialorder %v772_v10, 8.507059e+37 }
 0x2d2   :  { %v752_v47 = vadd.f32 %v1340_v35, %v751_v45 }
 0x2d4   :  { %v756_v49 = vsel %vm755_vm6, %v1340_v35, %v752_v47 }
 0x2d5   :  { %v761_v51 = vsel %vm758_vm7, %v760_v48, %v756_v49  ;;  %v1344_v62 = vpop.eup %1343 }
 0x2d6   :  { %798 = vrot.lane.b32.xlu1 %v761_v51, %s1489_s9  ;;  %v764_v4 = vmul.f32 %v1344_v62, %v657_v15  ;;  %vm769_vm8 = vweird.f32 %v1344_v62 }
 0x2d7   :  { %vm770_vm10 = vmor %vm768_vm9, %vm769_vm8 }
 0x2d8   :  { %v765_v21 = vsub.f32 1.0, %v764_v4 }
 0x2da   :  { %v766_v54 = vmul.f32 %v1344_v62, %v765_v21 }
 0x2dc   :  { %v767_v9 = vadd.f32 %v1344_v62, %v766_v54 }
 0x310   :  { %v789_v63 = vpop.permute.xlu1 %788 }
 0x311   :  { %v811_v0 = vadd.f32 %v789_v63, %v1733_v11  ;;  %v774_v11 = vand.u32 2147483648, %v657_v15 }
 0x312   :  { %v791_v2 = vpop.permute.xlu2 %790 }
 0x313   :  { %v819_v1 = vmul.f32 0.5, %v811_v0  ;;  %v812_v50 = vadd.f32 %v791_v2, %v1747_v18  ;;  %v771_v18 = vsel %vm770_vm10, %v1344_v62, %v767_v9  ;;  %v775_v3 = vor.u32 1.1754944e-38, %v774_v11 }
 0x315   :  { %v820_v6 = vmul.f32 0.5, %v812_v50  ;;  %919 = vrot.lane.b32.xlu2 %v819_v1, %s1488_s3  ;;  %v776_v8 = vsel %vm773_vm11, %v775_v3, %v771_v18 }
 0x317   :  { %921 = vrot.lane.b32.xlu1 %v820_v6, %s1488_s3 }
 0x31a   :  { %v787_v40 = vpop.permute.xlu0 %786 }
 0x31b   :  { %v810_v7 = vadd.f32 %v787_v40, %v1739_v32 }
 0x31d   :  { %v818_v61 = vmul.f32 0.5, %v810_v7 }
 0x31f   :  { %917 = vrot.lane.b32.xlu0 %v818_v61, %s1488_s3  ;;  %v164_v61 = vand.u32 7, %v1539_v43  ;;  %v1027_v43 = vld [vmem:[#allocation7 + $0x228] sm:$0xff] }
 0x327   :  { %800 = vrot.lane.b32.xlu0 %v776_v8, %s1489_s9 }
 0x32a   :  { %v797_v5 = vpop.permute.xlu2 %796 }
 0x32b   :  { %v815_v16 = vadd.f32 %v797_v5, %v746_v41  ;;  %v885_v41 = vpop.f32.mrf.mxu3  ;;  %v1029_v5 = vld [vmem:[#allocation7 + $0x238] sm:$0xff] }
 0x32c   :  { %v886_v44 = vadd.f32 %v1305_v13, %v885_v41  ;;  %v1093_v41 = vld [vmem:[#allocation7 + $0x30] sm:$0xff] }
 0x32d   :  { %v823_v17 = vmul.f32 0.5, %v815_v16  ;;  %v1028_v16 = vld [vmem:[#allocation7 + $0x230] sm:$0xff] }
 0x32f   :  { %927 = vrot.lane.b32.xlu1 %v823_v17, %s1488_s3  ;;  %v1026_v17 = vld [vmem:[#allocation7 + $0x220] sm:$0xff] }
 0x330   :  { %v793_v32 = vpop.permute.xlu0 %792 }
 0x331   :  { %v813_v12 = vadd.f32 %v793_v32, %v1752_v14  ;;  %v1490_v14 = vmov 1.0   ;;  %v1025_v32 = vld [vmem:[#allocation7 + $0x218] sm:$0xff] }
 0x332   :  { %1276 = vmatpush.msk.msra.mxu0 %vm170_vm12, %v1490_v14  ;;  %v1346_v14 = vpop.eup %1345 }
 0x333   :  { %v821_v19 = vmul.f32 0.5, %v813_v12  ;;  %v888_v48 = vpop.f32.mrf.mxu3  ;;  %v1024_v12 = vld [vmem:[#allocation7 + $0x210] sm:$0xff]  ;;  %vm1066_vm13 = vweird.f32 %v1346_v14 }
 0x334   :  { %v889_v10 = vadd.f32 %v1305_v13, %v888_v48  ;;  %v1134_v48 = vld [vmem:[#allocation7 + $0x1a8] sm:$0xff] }
 0x335   :  { %923 = vrot.lane.b32.xlu2 %v821_v19, %s1488_s3  ;;  %v1022_v19 = vld [vmem:[#allocation7 + $0x200] sm:$0xff] }
 0x33a   :  { %v795_v20 = vpop.permute.xlu1 %794 }
 0x33b   :  { %v814_v22 = vadd.f32 %v795_v20, %v1756_v29 }
 0x33d   :  { %v822_v23 = vmul.f32 0.5, %v814_v22  ;;  %v1306_v22 = vld [vmem:[#allocation8 + $0x5] ss:$0 sm:$0xff] }
 0x33f   :  { %925 = vrot.lane.b32.xlu0 %v822_v23, %s1488_s3 }
 0x348   :  { %v799_v24 = vpop.permute.xlu1 %798 }
 0x349   :  { %v816_v25 = vadd.f32 %v799_v24, %v761_v51  ;;  %v891_v51 = vpop.f32.mrf.mxu3 }
 0x34a   :  { %v892_v9 = vadd.f32 %v1305_v13, %v891_v51 }
 0x34b   :  { %v824_v26 = vmul.f32 0.5, %v816_v25  ;;  %v1351_v25 = vld [vmem:[#allocation2] sm:$0xff] }
 0x34d   :  { %929 = vrot.lane.b32.xlu2 %v824_v26, %s1488_s3 }
 0x351   :  { %v894_v56 = vpop.f32.mrf.mxu3 }
 0x352   :  { %v895_v7 = vadd.f32 %v1305_v13, %v894_v56 }
 0x359   :  { %v897_v57 = vpop.f32.mrf.mxu3 }
 0x35a   :  { %v898_v21 = vadd.f32 %v1305_v13, %v897_v57  ;;  %v1131_v57 = vld [vmem:[#allocation7 + $0x190] sm:$0xff] }
 0x361   :  { %v900_v59 = vpop.f32.mrf.mxu3 }
 0x362   :  { %v901_v4 = vadd.f32 %v1305_v13, %v900_v59  ;;  %v1129_v59 = vld [vmem:[#allocation7 + $0x180] sm:$0xff] }
 0x369   :  { %v903_v15 = vpop.f32.mrf.mxu3 }
 0x36a   :  { %v904_v1 = vadd.f32 %v1305_v13, %v903_v15  ;;  %v1128_v15 = vld [vmem:[#allocation7 + $0x178] sm:$0xff] }
 0x36f   :  { %v920_v31 = vpop.permute.xlu2 %919 }
 0x371   :  { %v906_v63 = vpop.f32.mrf.mxu3 }
 0x372   :  { %v907_v0 = vadd.f32 %v1305_v13, %v906_v63  ;;  %v1094_v13 = vld [vmem:[#allocation7 + $0x38] sm:$0xff]  ;;  %v1127_v63 = vld [vmem:[#allocation7 + $0x170] sm:$0xff] }
 0x389   :  { %v922_v35 = vpop.permute.xlu1 %921 }
 0x38f   :  { %v924_v36 = vpop.permute.xlu2 %923 }
 0x391   :  { %v918_v30 = vpop.permute.xlu0 %917 }
 0x392   :  { %1277 = vmatmul.msk.f32.vlgmr.msra.gmra.mxu0 %vm324_vm3, %v918_v30  ;;  %v1062_v30 = vmul.f32 32.0, %v1346_v14 }
 0x399   :  { %v801_v29 = vpop.permute.xlu0 %800 }
 0x39a   :  { %v817_v33 = vadd.f32 %v801_v29, %v776_v8  ;;  %1278 = vmatmul.msk.f32.gmra.mxu0 %vm324_vm3, %v920_v31  ;;  %v1063_v31 = vsub.f32 1.0, %v1062_v30 }
 0x39c   :  { %v825_v34 = vmul.f32 0.5, %v817_v33  ;;  %v1064_v29 = vmul.f32 %v1346_v14, %v1063_v31 }
 0x39e   :  { %931 = vrot.lane.b32.xlu0 %v825_v34, %s1488_s3  ;;  %v1065_v33 = vadd.f32 %v1346_v14, %v1064_v29 }
 0x3a0   :  { %v1794_v34 = vsel %vm1066_vm13, %v1346_v14, %v1065_v33 }
 0x3a1   :  { %v928_v38 = vpop.permute.xlu1 %927 }
 0x3a2   :  { %1279 = vmatmul.msk.f32.gmra.mxu0 %vm324_vm3, %v922_v35 }
 0x3a7   :  { %v930_v39 = vpop.permute.xlu2 %929 }
 0x3aa   :  { %1280 = vmatmul.msk.f32.gmra.mxu0 %vm324_vm3, %v924_v36 }
 0x3b1   :  { %v926_v37 = vpop.permute.xlu0 %925 }
 0x3b2   :  { %1281 = vmatmul.msk.f32.gmra.mxu0 %vm324_vm3, %v926_v37 }
 0x3ba   :  { %1282 = vmatmul.msk.f32.gmra.mxu0 %vm324_vm3, %v928_v38 }
 0x3c2   :  { %1283 = vmatmul.msk.f32.gmra.mxu0 %vm324_vm3, %v930_v39 }
 0x40f   :  { %v966_v45 = vpop.f32.mrf.mxu0 }
 0x410   :  { %v990_v46 = vmul.f32 %v966_v45, %v886_v44  ;;  %v932_v47 = vpop.permute.xlu0 %931  ;;  %v1092_v44 = vld [vmem:[#allocation7 + $0x28] sm:$0xff]  ;;  %v1091_v45 = vld [vmem:[#allocation7 + $0x20] sm:$0xff] }
 0x411   :  { %1284 = vmatmul.msk.f32.gmra.mxu0 %vm324_vm3, %v932_v47  ;;  %vm165_vm3 = vcmp.eq.s32.totalorder %v164_v61, %v1537_v42  ;;  %v1023_v42 = vld [vmem:[#allocation7 + $0x208] sm:$0xff]  ;;  %v1135_v47 = vld [vmem:[#allocation7 + $0x1b0] sm:$0xff]  ;;  %v1308_v61 = vld [vmem:[#allocation8 + $0x7] ss:$0 sm:$0xff] }
 0x412   :  { %v1225_v8 = vsel %vm165_vm3, 1.0, %v1486_v55 }
 0x417   :  { %v969_v49 = vpop.f32.mrf.mxu0 }
 0x418   :  { %v991_v3 = vmul.f32 %v969_v49, %v889_v10  ;;  %v1123_v10 = vld [vmem:[#allocation7 + $0x150] sm:$0xff] }
 0x41f   :  { %v972_v53 = vpop.f32.mrf.mxu0 }
 0x420   :  { %v992_v18 = vmul.f32 %v972_v53, %v892_v9  ;;  %v1133_v53 = vld [vmem:[#allocation7 + $0x1a0] sm:$0xff] }
 0x427   :  { %v975_v52 = vpop.f32.mrf.mxu0 }
 0x428   :  { %v993_v11 = vmul.f32 %v975_v52, %v895_v7  ;;  %v1132_v52 = vld [vmem:[#allocation7 + $0x198] sm:$0xff] }
 0x42f   :  { %v978_v58 = vpop.f32.mrf.mxu0 }
 0x430   :  { %v994_v54 = vmul.f32 %v978_v58, %v898_v21  ;;  %v1130_v58 = vld [vmem:[#allocation7 + $0x188] sm:$0xff] }
 0x437   :  { %v981_v60 = vpop.f32.mrf.mxu0 }
 0x438   :  { %v995_v40 = vmul.f32 %v981_v60, %v901_v4 }
 0x43f   :  { %v984_v62 = vpop.f32.mrf.mxu0 }
 0x440   :  { %v996_v6 = vmul.f32 %v984_v62, %v904_v1 }
 0x48e   :  { %v987_v2 = vpop.f32.mrf.mxu0 }
 0x48f   :  { %v997_v50 = vmul.f32 %v987_v2, %v907_v0  ;;  %v1126_v2 = vld [vmem:[#allocation7 + $0x168] sm:$0xff] }
 0x491   :  { %1009 = vmatpush.msra.mxu1 %v997_v50  ;;  %v1125_v50 = vld [vmem:[#allocation7 + $0x160] sm:$0xff] }
 0x493   :  { %1010 = vmatpush.msra.mxu1 %v996_v6  ;;  %v1124_v6 = vld [vmem:[#allocation7 + $0x158] sm:$0xff] }
 0x495   :  { %1011 = vmatpush.msra.mxu1 %v995_v40  ;;  %v1307_v40 = vld [vmem:[#allocation8 + $0x6] ss:$0 sm:$0xff] }
 0x497   :  { %1012 = vmatpush.msra.mxu1 %v994_v54 }
 0x499   :  { %1013 = vmatpush.msra.mxu1 %v993_v11 }
 0x49b   :  { %1014 = vmatpush.msra.mxu1 %v992_v18  ;;  %v1122_v18 = vld [vmem:[#allocation7 + $0x148] sm:$0xff] }
 0x49d   :  { %1015 = vmatpush.msra.mxu1 %v991_v3  ;;  %v1121_v3 = vld [vmem:[#allocation7 + $0x140] sm:$0xff] }
 0x49f   :  { %1016 = vmatpush.msra.mxu1 %v990_v46  ;;  %v1136_v46 = vld [vmem:[#allocation7 + $0x1b8] sm:$0xff] }
 0x4a0   :  { %1285 = vmatmul.msk.f32.vlgmr.msra.gmra.mxu1 %vm214_vm1, %v1225_v8  ;;  %1137 = vmatpush.msra.mxu2 %v1136_v46  ;;  %v1309_v8 = vld [vmem:[#allocation8 + $0x1] ss:$0 sm:$0xff] }
 0x4a1   :  { %1043 = vmatpush.msrb.mxu1 %v1029_v5 }
 0x4a2   :  { %1138 = vmatpush.msra.mxu2 %v1135_v47 }
 0x4a3   :  { %1044 = vmatpush.msrb.mxu1 %v1028_v16 }
 0x4a4   :  { %1139 = vmatpush.msra.mxu2 %v1134_v48 }
 0x4a5   :  { %1045 = vmatpush.msrb.mxu1 %v1027_v43 }
 0x4a6   :  { %1140 = vmatpush.msra.mxu2 %v1133_v53 }
 0x4a7   :  { %1046 = vmatpush.msrb.mxu1 %v1026_v17  ;;  %v1310_v17 = vld [vmem:[#allocation8 + $0xa] ss:$0 sm:$0xff] }
 0x4a8   :  { %1141 = vmatpush.msra.mxu2 %v1132_v52 }
 0x4a9   :  { %1047 = vmatpush.msrb.mxu1 %v1025_v32 }
 0x4aa   :  { %1142 = vmatpush.msra.mxu2 %v1131_v57 }
 0x4ab   :  { %1048 = vmatpush.msrb.mxu1 %v1024_v12 }
 0x4ac   :  { %1143 = vmatpush.msra.mxu2 %v1130_v58 }
 0x4ad   :  { %1049 = vmatpush.msrb.mxu1 %v1023_v42 }
 0x4ae   :  { %1144 = vmatpush.msra.mxu2 %v1129_v59 }
 0x4af   :  { %1050 = vmatpush.msrb.mxu1 %v1022_v19 }
 0x4b0   :  { %1145 = vmatpush.msra.mxu2 %v1128_v15 }
 0x4b1   :  { %1112 = vmatpush.msra.mxu1 %v1094_v13 }
 0x4b2   :  { %1146 = vmatpush.msra.mxu2 %v1127_v63 }
 0x4b3   :  { %1113 = vmatpush.msra.mxu1 %v1093_v41 }
 0x4b4   :  { %1147 = vmatpush.msra.mxu2 %v1126_v2 }
 0x4b5   :  { %1114 = vmatpush.msra.mxu1 %v1092_v44 }
 0x4b6   :  { %1148 = vmatpush.msra.mxu2 %v1125_v50 }
 0x4b7   :  { %1115 = vmatpush.msra.mxu1 %v1091_v45 }
 0x4b8   :  { %1149 = vmatpush.msra.mxu2 %v1124_v6 }
 0x4ba   :  { %1150 = vmatpush.msra.mxu2 %v1123_v10 }
 0x4bc   :  { %1151 = vmatpush.msra.mxu2 %v1122_v18 }
 0x4be   :  { %1152 = vmatpush.msra.mxu2 %v1121_v3 }
 0x51d   :  { %v1018_v55 = vpop.f32.mrf.mxu1 }
 0x51e   :  { %v1021_v20 = vmax.f32 %v1018_v55, 0.0 }
 0x520   :  { %1286 = vmatmul.msk.f32.vlgmr.msrb.gmra.mxu1 %vm214_vm1, %v1021_v20 }
 0x59d   :  { %v1052_v23 = vpop.f32.mrf.mxu1 }
 0x59e   :  { %v1053_v24 = vadd.f32 %v1306_v22, %v1052_v23 }
 0x5a0   :  { %v1055_v26 = vadd.f32 %v1351_v25, %v1053_v24 }
 0x5a2   :  { %v1058_v27 = vsel %vm179_vm0, %v1055_v26, 0.0 }
 0x5a3   :  { %1059 = vadd.xlane.f32.xlu1 %v1058_v27 }
 0x616   :  { %v1060_v35 = vpop.xlane.xlu1 %1059 }
 0x617   :  { %v1068_v36 = vmul.f32 %v1794_v34, %v1060_v35  ;;  %v1311_v35 = vld [vmem:[#allocation8 + $0x8] ss:$0 sm:$0xff] }
 0x619   :  { %v1069_v37 = vsub.f32 %v1055_v26, %v1068_v36 }
 0x61b   :  { %v1070_v38 = vmul.f32 %v1069_v37, %v1069_v37 }
 0x61d   :  { %v1071_v39 = vsel %vm179_vm0, %v1070_v38, 0.0  ;;  %v1312_v38 = vld [vmem:[#allocation8 + $0x9] ss:$0 sm:$0xff] }
 0x61e   :  { %1072 = vadd.xlane.f32.xlu2 %v1071_v39 }
 0x691   :  { %v1073_v49 = vpop.xlane.xlu2 %1072 }
 0x692   :  { %v1074_v51 = vmul.f32 %v1073_v49, %v1794_v34 }
 0x694   :  { %v1075_v56 = vadd.f32 1e-05, %v1074_v51 }
 0x696   :  { %1347 = vrsqrt.f32 %v1075_v56  ;;  %vm1082_vm14 = vweird.f32 %v1075_v56 }
 0x69c   :  { %v1348_v60 = vpop.eup %1347 }
 0x69d   :  { %v1077_v62 = vmul.f32 %v1348_v60, %v1075_v56  ;;  %vm1083_vm1 = vweird.f32 %v1348_v60 }
 0x69e   :  { %vm1084_vm15 = vmor %vm1082_vm14, %vm1083_vm1 }
 0x69f   :  { %v1078_v0 = vmul.f32 %v1348_v60, %v1077_v62 }
 0x6a1   :  { %v1079_v1 = vmul.f32 0.5, %v1078_v0 }
 0x6a3   :  { %v1080_v4 = vsub.f32 1.5, %v1079_v1 }
 0x6a5   :  { %v1081_v21 = vmul.f32 %v1348_v60, %v1080_v4 }
 0x6a7   :  { %v1085_v7 = vsel %vm1084_vm15, %v1348_v60, %v1081_v21 }
 0x6a8   :  { %v1086_v54 = vmul.f32 %v1085_v7, %v1069_v37 }
 0x6aa   :  { %v1088_v9 = vmul.f32 %v1307_v40, %v1086_v54 }
 0x6ac   :  { %v1090_v11 = vadd.f32 %v1308_v61, %v1088_v9 }
 0x6ae   :  { %1287 = vmatmul.msk.f32.vlgmr.msra.gmra.mxu1 %vm179_vm0, %v1090_v11 }
 0x72b   :  { %v1117_v5 = vpop.f32.mrf.mxu1 }
 0x72c   :  { %v1118_v16 = vadd.f32 %v1309_v8, %v1117_v5 }
 0x72e   :  { %v1120_v43 = vmax.f32 %v1118_v16, 0.0 }
 0x730   :  { %1153 = vmatmul.f32.vlgmr.msra.gmra.mxu2 %v1120_v43 }
 0x7b3   :  { %v1154_v32 = vpop.f32.mrf.mxu2 }
 0x7b4   :  { %v1157_v12 = vadd.f32 %v1154_v32, %v1090_v11 }
 0x7b6   :  { %v1160_v42 = vadd.f32 %v1310_v17, %v1157_v12 }
 0x7b8   :  { %v1163_v19 = vsel %vm179_vm0, %v1160_v42, 0.0 }
 0x7b9   :  { %1164 = vadd.xlane.f32.xlu0 %v1163_v19 }
 0x82c   :  { %v1165_v55 = vpop.xlane.xlu0 %1164 }
 0x82d   :  { %v1166_v20 = vmul.f32 %v1165_v55, %v1794_v34 }
 0x82f   :  { %v1167_v22 = vsub.f32 %v1160_v42, %v1166_v20 }
 0x831   :  { %v1168_v23 = vmul.f32 %v1167_v22, %v1167_v22 }
 0x833   :  { %v1169_v24 = vsel %vm179_vm0, %v1168_v23, 0.0 }
 0x834   :  { %1170 = vadd.xlane.f32.xlu2 %v1169_v24 }
 0x8a7   :  { %v1171_v25 = vpop.xlane.xlu2 %1170 }
 0x8a8   :  { %v1172_v26 = vmul.f32 %v1171_v25, %v1794_v34 }
 0x8aa   :  { %v1173_v27 = vadd.f32 1e-05, %v1172_v26 }
 0x8ac   :  { %1349 = vrsqrt.f32 %v1173_v27  ;;  %vm1180_vm4 = vweird.f32 %v1173_v27 }
 0x8b2   :  { %v1350_v28 = vpop.eup %1349 }
 0x8b3   :  { %v1175_v14 = vmul.f32 %v1350_v28, %v1173_v27  ;;  %vm1181_vm2 = vweird.f32 %v1350_v28 }
 0x8b4   :  { %vm1182_vm5 = vmor %vm1180_vm4, %vm1181_vm2 }
 0x8b5   :  { %v1176_v30 = vmul.f32 %v1350_v28, %v1175_v14 }
 0x8b7   :  { %v1177_v31 = vmul.f32 0.5, %v1176_v30 }
 0x8b9   :  { %v1178_v29 = vsub.f32 1.5, %v1177_v31 }
 0x8bb   :  { %v1179_v33 = vmul.f32 %v1350_v28, %v1178_v29 }
 0x8bd   :  { %v1183_v36 = vsel %vm1182_vm5, %v1350_v28, %v1179_v33 }
 0x8be   :  { %v1184_v37 = vmul.f32 %v1183_v36, %v1167_v22 }
 0x8c0   :  { %v1186_v34 = vmul.f32 %v1311_v35, %v1184_v37 }
 0x8c2   :  { %v1188_v39 = vadd.f32 %v1312_v38, %v1186_v34 }
 0x8c4   :  { %1189 = vst.msk [vmem:[#allocation10] sm:$0xff] %vm179_vm0, %v1188_v39 }
 0x8c5   :  { %1200 = dma.vmem_to_hbm [thread:$0]  %s1196_s11, 128, %s1198_s14, [#allocation4]  }
 0x8c6   :  { %1478 = dma.done.wait [#allocation4], 128  }
 0x8c7   :  { %1479 = vsyncadd [#allocation4], 4294967168 }
 0x8c8   :  { %1205 = vsyncpa [#allocation3], 1 }
 0x8c9   :  { %1206 = vsyncpa [#allocation6], 1 }
 0x8ca   :  { %1207 = vsyncpa [#allocation9], 1 }
 0x8cb   :  { %1208 = vsyncpa [#allocation4], 1 }

</bundles_post_ra>
